<compile_context>
chip_gen: v5e
topology: v5e:2x2
jax: 0.10.0
libtpu: 0.0.40
codegen_flags: <defaults>
</compile_context>

<pallas_src>
import jax
import jax.numpy as jnp
import numpy as np
from jax.experimental import pallas as pl
from jax.experimental.pallas import tpu as pltpu

LANE = 128


def _round_up(x, m):
    return ((x + m - 1) // m) * m


def _cdiv(a, b):
    return (a + b - 1) // b


# --------------------------------------------------------------------------- #
# Kernel
# --------------------------------------------------------------------------- #
def gru_memory_updater_kernel(
    dt_ref, mem_input_ref, mem_ref, h_ref,
    time_w_ref, time_b_ref,
    w_ih_mem_ref, w_ih_time_ref, w_hh_ref, b_ih_ref, b_hh_ref,
    w_nf_ref, b_nf_ref,
    new_mem_ref, h_out_ref,
):
    H = new_mem_ref.shape[-1]             # true hidden width
    Hp = b_ih_ref.shape[-1] // 3          # lane-padded per-gate width (mult. of 128)
    cdt = w_ih_mem_ref.dtype              # MXU operand dtype (bf16 fast path / f32)

    # --- TimeEncode: cos(dt * w + b), kept in f32 (w spans 1 .. 1e-9) --------
    time_feat = jnp.cos(dt_ref[...] * time_w_ref[...] + time_b_ref[...])   # (T, Dt)

    # --- GRUCell --------------------------------------------------------------
    # gi = concat([mem_input, time_feat]) @ W_ih^T + b_ih, folded into two
    # matmuls against the row-split of W_ih (identical math; avoids an
    # in-kernel lane concat).  Gates live at 128-aligned columns {0, Hp, 2Hp}.
    gi = (jnp.dot(mem_input_ref[...].astype(cdt), w_ih_mem_ref[...],
                  preferred_element_type=jnp.float32)
          + jnp.dot(time_feat.astype(cdt), w_ih_time_ref[...],
                    preferred_element_type=jnp.float32)
          + b_ih_ref[...])                                                  # (T, 3*Hp)
    h_prev = mem_ref[...]                                                   # (T, H) f32
    gh = (jnp.dot(h_prev.astype(cdt), w_hh_ref[...],
                  preferred_element_type=jnp.float32)
          + b_hh_ref[...])                                                  # (T, 3*Hp)

    # Lane-aligned gate slices (each starts at a 128 boundary); gate math in f32
    # at width H only.
    r = jax.nn.sigmoid(gi[:, 0:H] + gh[:, 0:H])
    z = jax.nn.sigmoid(gi[:, Hp:Hp + H] + gh[:, Hp:Hp + H])
    n = jnp.tanh(gi[:, 2 * Hp:2 * Hp + H] + r * gh[:, 2 * Hp:2 * Hp + H])

    new_mem = (1.0 - z) * n + z * h_prev                                    # (T, H) f32
    new_mem_ref[...] = new_mem.astype(new_mem_ref.dtype)

    # --- combine_node_feature (dim_node_feat != dim_hid branch) ---------------
    h_out_ref[...] = (new_mem
                      + jnp.dot(h_ref[...].astype(cdt), w_nf_ref[...],
                                preferred_element_type=jnp.float32)
                      + b_nf_ref[...]).astype(h_out_ref.dtype)


# --------------------------------------------------------------------------- #
# One-time parameter preparation (hoisted out of the per-call path)
# --------------------------------------------------------------------------- #
def _pad_gate_cols(w, H, Hp):
    """(..., 3*H) -> (..., 3*Hp): gate g placed at columns [g*Hp, g*Hp+H)."""
    out = jnp.zeros(w.shape[:-1] + (3 * Hp,), w.dtype)
    for g in range(3):
        out = out.at[..., g * Hp:g * Hp + H].set(w[..., g * H:(g + 1) * H])
    return out


def prepare_params(params, *, use_bf16=True):
    """Pad / cast the weights ONCE.  Returns a dict of arrays only (jit-friendly
    pytree).  Gate columns of W_ih / W_hh / biases are moved to 128-aligned
    offsets; matmul weights are bf16 on the fast path, biases stay f32."""
    cdt = jnp.bfloat16 if use_bf16 else jnp.float32
    H = params["w_hh"].shape[0]
    Hp = _round_up(max(H, LANE), LANE)
    return {
        "time_w": params["time_w"].astype(jnp.float32),
        "time_b": params["time_b"].astype(jnp.float32),
        "w_ih_mem": _pad_gate_cols(params["w_ih_mem"], H, Hp).astype(cdt),
        "w_ih_time": _pad_gate_cols(params["w_ih_time"], H, Hp).astype(cdt),
        "w_hh": _pad_gate_cols(params["w_hh"], H, Hp).astype(cdt),
        "b_ih": _pad_gate_cols(params["b_ih"], H, Hp).astype(jnp.float32),
        "b_hh": _pad_gate_cols(params["b_hh"], H, Hp).astype(jnp.float32),
        "w_nf": params["w_nf"].astype(cdt),
        "b_nf": params["b_nf"].astype(jnp.float32),
    }


# --------------------------------------------------------------------------- #
# Per-call wrapper (jit-compatible)
# --------------------------------------------------------------------------- #
def gru_memory_updater(ts, mem_ts, mem_input, mem, h, nid, prep, *, tile=2048):
    """Returns (updated_memory, h_out, last_updated_ts, last_updated_nid).

    `prep` is the output of prepare_params(); per-node tensors are streamed
    unpadded and outputs come back as (N, H), so `updated_memory` can be fed
    directly back as the next call's `mem` (no pad/slice HBM passes).
    """
    N = ts.shape[0]
    dim_in = mem_input.shape[1]
    dim_nf = h.shape[1]
    dim_time = prep["time_w"].shape[1]
    H = prep["w_nf"].shape[1]
    Hp = prep["b_ih"].shape[1] // 3
    cdt = prep["w_ih_mem"].dtype
    use_bf16 = cdt == jnp.bfloat16

    # Large row tiles (per-step overhead ~0.35 us), but keep >= 2 grid steps
    # whenever N allows so "parallel" shards across both v7x TensorCores.
    # Multiple of 16 for bf16 sublane packing (8 for f32).  The last block may
    # run past N: Pallas clips the DMA and drops out-of-bounds stores; rows are
    # independent, so no explicit masking is needed.
    sub = 16 if use_bf16 else 8
    tile_eff = max(sub, min(tile, _round_up(_cdiv(N, 2), sub)))
    grid = _cdiv(N, tile_eff)

    dt = (ts - mem_ts).astype(jnp.float32).reshape(N, 1)

    inputs = (dt, mem_input, mem, h,
              prep["time_w"], prep["time_b"],
              prep["w_ih_mem"], prep["w_ih_time"], prep["w_hh"],
              prep["b_ih"], prep["b_hh"], prep["w_nf"], prep["b_nf"])

    row = lambda i: (i, 0)     # tiled over node rows
    rep = lambda i: (0, 0)     # broadcast parameters

    # Recurrent state stays f32; h_out in bf16 on the fast path (half the bytes).
    out_dt = jnp.bfloat16 if use_bf16 else jnp.float32

    flops = (2 * N * 3 * Hp * (dim_in + dim_time + H)
             + 2 * N * dim_nf * H
             + 14 * N * H)
    transcendentals = N * (dim_time + 3 * H)
    bytes_accessed = int(sum(int(x.size) * x.dtype.itemsize for x in inputs)
                         + N * H * 4 + N * H * jnp.dtype(out_dt).itemsize)

    new_mem, h_out = pl.pallas_call(
        gru_memory_updater_kernel,
        out_shape=(jax.ShapeDtypeStruct((N, H), jnp.float32),
                   jax.ShapeDtypeStruct((N, H), out_dt)),
        grid_spec=pltpu.PrefetchScalarGridSpec(
            num_scalar_prefetch=0,
            grid=(grid,),
            in_specs=[
                pl.BlockSpec((tile_eff, 1), row),            # dt
                pl.BlockSpec((tile_eff, dim_in), row),       # mem_input
                pl.BlockSpec((tile_eff, H), row),            # mem (f32 state)
                pl.BlockSpec((tile_eff, dim_nf), row),       # h (node feat)
                pl.BlockSpec((1, dim_time), rep),            # time_w
                pl.BlockSpec((1, dim_time), rep),            # time_b
                pl.BlockSpec((dim_in, 3 * Hp), rep),         # W_ih (mem_input rows)
                pl.BlockSpec((dim_time, 3 * Hp), rep),       # W_ih (time_feat rows)
                pl.BlockSpec((H, 3 * Hp), rep),              # W_hh
                pl.BlockSpec((1, 3 * Hp), rep),              # b_ih
                pl.BlockSpec((1, 3 * Hp), rep),              # b_hh
                pl.BlockSpec((dim_nf, H), rep),              # node_feat_map W
                pl.BlockSpec((1, H), rep),                   # node_feat_map b
            ],
            out_specs=(pl.BlockSpec((tile_eff, H), row),
                       pl.BlockSpec((tile_eff, H), row)),
        ),
        compiler_params=pltpu.CompilerParams(
            dimension_semantics=("parallel",)),
        cost_estimate=pl.CostEstimate(
            flops=int(flops),
            transcendentals=int(transcendentals),
            bytes_accessed=bytes_accessed),
    )(*inputs)

    # last_updated_ts / last_updated_nid are detached copies of the inputs.
    return new_mem, h_out, ts, nid


# --------------------------------------------------------------------------- #
# Synthetic parameters + pure-JAX reference
# --------------------------------------------------------------------------- #
def make_params(key, dim_in, dim_time, dim_hid, dim_nf):
    """Deterministic synthetic parameters (PyTorch-style init scales)."""
    ks = jax.random.split(key, 6)
    k_gru = 1.0 / np.sqrt(dim_hid)
    k_lin = 1.0 / np.sqrt(dim_nf)
    u = lambda k, shape, s: jax.random.uniform(k, shape, jnp.float32, -s, s)

    # GRUCell weights, transposed to [in, out]; gate order r,z,n on the out axis.
    w_ih = u(ks[0], (dim_in + dim_time, 3 * dim_hid), k_gru)
    return {
        "w_ih_mem": w_ih[:dim_in, :],
        "w_ih_time": w_ih[dim_in:, :],
        "w_hh": u(ks[1], (dim_hid, 3 * dim_hid), k_gru),
        "b_ih": u(ks[2], (1, 3 * dim_hid), k_gru),
        "b_hh": u(ks[3], (1, 3 * dim_hid), k_gru),
        # TimeEncode: w = 1 / 10**linspace(0, 9, dim_time), b = 0
        "time_w": jnp.asarray(
            1.0 / 10.0 ** np.linspace(0, 9, dim_time, dtype=np.float32)
        ).reshape(1, dim_time),
        "time_b": jnp.zeros((1, dim_time), jnp.float32),
        # node_feat_map: Linear(dim_nf, dim_hid)
        "w_nf": u(ks[4], (dim_nf, dim_hid), k_lin),
        "b_nf": u(ks[5], (1, dim_hid), k_lin),
    }


def reference(ts, mem_ts, mem_input, mem, h, p):
    """Pure-JAX reference mirroring torch semantics."""
    H = mem.shape[1]
    dt = (ts - mem_ts)[:, None]
    time_feat = jnp.cos(dt * p["time_w"] + p["time_b"])
    x = jnp.concatenate([mem_input, time_feat], axis=1)
    w_ih = jnp.concatenate([p["w_ih_mem"], p["w_ih_time"]], axis=0)
    gi = x @ w_ih + p["b_ih"]
    gh = mem @ p["w_hh"] + p["b_hh"]
    r = jax.nn.sigmoid(gi[:, :H] + gh[:, :H])
    z = jax.nn.sigmoid(gi[:, H:2 * H] + gh[:, H:2 * H])
    n = jnp.tanh(gi[:, 2 * H:] + r * gh[:, 2 * H:])
    new_mem = (1.0 - z) * n + z * mem
    h_out = new_mem + h @ p["w_nf"] + p["b_nf"]
    return new_mem, h_out


if __name__ == "__main__":
    # Small config consistent with the module:
    #   dim_in=32 (mem_input), dim_time=16, dim_hid=32, dim_node_feat=16 (!= dim_hid),
    #   memory_param = {'combine_node_feature': True}; N=50 source nodes (not a
    #   tile multiple, so the ragged last block is exercised).
    N, dim_in, dim_time, dim_hid, dim_nf = 50, 32, 16, 32, 16

    key = jax.random.PRNGKey(0)
    k_p, k_ts, k_mts, k_mi, k_mem, k_h = jax.random.split(key, 6)

    params = make_params(k_p, dim_in, dim_time, dim_hid, dim_nf)

    ts = jax.random.uniform(k_ts, (N,), jnp.float32, 0.0, 100.0)
    mem_ts = ts - jax.random.uniform(k_mts, (N,), jnp.float32, 0.0, 10.0)
    mem_input = jax.random.normal(k_mi, (N, dim_in), jnp.float32)
    mem = jax.random.normal(k_mem, (N, dim_hid), jnp.float32)
    h = jax.random.normal(k_h, (N, dim_nf), jnp.float32)
    nid = jnp.arange(N, dtype=jnp.int32)

    ref_mem, ref_h = reference(ts, mem_ts, mem_input, mem, h, params)

    updater = jax.jit(gru_memory_updater, static_argnames=("tile",))

    # 1) Exact-semantics check: f32 MXU operands, tight tolerance, ragged last tile.
    prep32 = prepare_params(params, use_bf16=False)
    new_mem32, h_out32, _, _ = updater(ts, mem_ts, mem_input, mem, h, nid, prep32)
    jax.block_until_ready((new_mem32, h_out32))
    np.testing.assert_allclose(np.asarray(new_mem32), np.asarray(ref_mem),
                               rtol=1e-5, atol=1e-5)
    np.testing.assert_allclose(np.asarray(h_out32), np.asarray(ref_h),
                               rtol=1e-5, atol=1e-5)

    # 2) Fast path: bf16 MXU operands + bf16 h_out writeback; recurrent state,
    #    TimeEncode, biases and gate math stay f32.
    prep16 = prepare_params(params, use_bf16=True)
    new_mem, h_out, last_ts, last_nid = updater(ts, mem_ts, mem_input, mem, h, nid, prep16)
    jax.block_until_ready((new_mem, h_out, last_ts, last_nid))
    np.testing.assert_allclose(np.asarray(new_mem), np.asarray(ref_mem),
                               rtol=2e-2, atol=2e-2)
    np.testing.assert_allclose(np.asarray(h_out).astype(np.float32),
                               np.asarray(ref_h), rtol=2e-2, atol=2e-2)

    print("KERNEL_OK")
</pallas_src>

<mosaic_0001>
module attributes {stable_mosaic.version = 11 : i64} {
  func.func @gru_memory_updater_kernel(%arg0: i32, %arg1: memref<32x1xf32, #tpu.memory_space<vmem>>, %arg2: memref<32x32xf32, #tpu.memory_space<vmem>>, %arg3: memref<32x32xf32, #tpu.memory_space<vmem>>, %arg4: memref<32x16xf32, #tpu.memory_space<vmem>>, %arg5: memref<1x16xf32, #tpu.memory_space<vmem>>, %arg6: memref<1x16xf32, #tpu.memory_space<vmem>>, %arg7: memref<32x384xf32, #tpu.memory_space<vmem>>, %arg8: memref<16x384xf32, #tpu.memory_space<vmem>>, %arg9: memref<32x384xf32, #tpu.memory_space<vmem>>, %arg10: memref<1x384xf32, #tpu.memory_space<vmem>>, %arg11: memref<1x384xf32, #tpu.memory_space<vmem>>, %arg12: memref<16x32xf32, #tpu.memory_space<vmem>>, %arg13: memref<1x32xf32, #tpu.memory_space<vmem>>, %arg14: memref<32x32xf32, #tpu.memory_space<vmem>>, %arg15: memref<32x32xf32, #tpu.memory_space<vmem>>) attributes {dimension_semantics = [#tpu.dimension_semantics<parallel>], iteration_bounds = array<i64: 2>, scalar_prefetch = 0 : i64, scratch_operands = 0 : i64, tpu.core_type = #tpu.core_type<tc>, window_params = [{transform_indices = @transform_0, window_bounds = array<i64: 32, 1>}, {transform_indices = @transform_1, window_bounds = array<i64: 32, 32>}, {transform_indices = @transform_2, window_bounds = array<i64: 32, 32>}, {transform_indices = @transform_3, window_bounds = array<i64: 32, 16>}, {pipeline_mode = #tpu.pipeline_mode<synchronous>, transform_indices = @transform_4, window_bounds = array<i64: 1, 16>}, {pipeline_mode = #tpu.pipeline_mode<synchronous>, transform_indices = @transform_5, window_bounds = array<i64: 1, 16>}, {pipeline_mode = #tpu.pipeline_mode<synchronous>, transform_indices = @transform_6, window_bounds = array<i64: 32, 384>}, {pipeline_mode = #tpu.pipeline_mode<synchronous>, transform_indices = @transform_7, window_bounds = array<i64: 16, 384>}, {pipeline_mode = #tpu.pipeline_mode<synchronous>, transform_indices = @transform_8, window_bounds = array<i64: 32, 384>}, {pipeline_mode = #tpu.pipeline_mode<synchronous>, transform_indices = @transform_9, window_bounds = array<i64: 1, 384>}, {pipeline_mode = #tpu.pipeline_mode<synchronous>, transform_indices = @transform_10, window_bounds = array<i64: 1, 384>}, {pipeline_mode = #tpu.pipeline_mode<synchronous>, transform_indices = @transform_11, window_bounds = array<i64: 16, 32>}, {pipeline_mode = #tpu.pipeline_mode<synchronous>, transform_indices = @transform_12, window_bounds = array<i64: 1, 32>}, {transform_indices = @transform_13, window_bounds = array<i64: 32, 32>}, {transform_indices = @transform_14, window_bounds = array<i64: 32, 32>}]} {
    %c0 = arith.constant 0 : index
    %c0_0 = arith.constant 0 : index
    %0 = vector.load %arg1[%c0, %c0_0] : memref<32x1xf32, #tpu.memory_space<vmem>>, vector<32x1xf32>
    %c0_1 = arith.constant 0 : index
    %c0_2 = arith.constant 0 : index
    %1 = vector.load %arg5[%c0_1, %c0_2] : memref<1x16xf32, #tpu.memory_space<vmem>>, vector<1x16xf32>
    %2 = vector.broadcast %0 : vector<32x1xf32> to vector<32x16xf32>
    %3 = vector.broadcast %1 : vector<1x16xf32> to vector<32x16xf32>
    %4 = arith.mulf %2, %3 : vector<32x16xf32>
    %c0_3 = arith.constant 0 : index
    %c0_4 = arith.constant 0 : index
    %5 = vector.load %arg6[%c0_3, %c0_4] : memref<1x16xf32, #tpu.memory_space<vmem>>, vector<1x16xf32>
    %6 = vector.broadcast %5 : vector<1x16xf32> to vector<32x16xf32>
    %7 = arith.addf %4, %6 : vector<32x16xf32>
    %8 = math.cos %7 : vector<32x16xf32>
    %c0_5 = arith.constant 0 : index
    %c0_6 = arith.constant 0 : index
    %9 = vector.load %arg2[%c0_5, %c0_6] : memref<32x32xf32, #tpu.memory_space<vmem>>, vector<32x32xf32>
    %c0_7 = arith.constant 0 : index
    %c0_8 = arith.constant 0 : index
    %10 = vector.load %arg7[%c0_7, %c0_8] : memref<32x384xf32, #tpu.memory_space<vmem>>, vector<32x384xf32>
    %cst = arith.constant dense<0.000000e+00> : vector<32x384xf32>
    %11 = tpu.matmul %9, %10, %cst {dimension_numbers = #tpu.dot_dimension_numbers<[1], [0], [0], [1], [0, 0, 1, 1], [], []>} : vector<32x32xf32>, vector<32x384xf32>, vector<32x384xf32> -> vector<32x384xf32>
    %c0_9 = arith.constant 0 : index
    %c0_10 = arith.constant 0 : index
    %12 = vector.load %arg8[%c0_9, %c0_10] : memref<16x384xf32, #tpu.memory_space<vmem>>, vector<16x384xf32>
    %cst_11 = arith.constant dense<0.000000e+00> : vector<32x384xf32>
    %13 = tpu.matmul %8, %12, %cst_11 {dimension_numbers = #tpu.dot_dimension_numbers<[1], [0], [0], [1], [0, 0, 1, 1], [], []>} : vector<32x16xf32>, vector<16x384xf32>, vector<32x384xf32> -> vector<32x384xf32>
    %14 = arith.addf %11, %13 : vector<32x384xf32>
    %c0_12 = arith.constant 0 : index
    %c0_13 = arith.constant 0 : index
    %15 = vector.load %arg10[%c0_12, %c0_13] : memref<1x384xf32, #tpu.memory_space<vmem>>, vector<1x384xf32>
    %16 = vector.broadcast %15 : vector<1x384xf32> to vector<32x384xf32>
    %17 = arith.addf %14, %16 : vector<32x384xf32>
    %c0_14 = arith.constant 0 : index
    %c0_15 = arith.constant 0 : index
    %18 = vector.load %arg3[%c0_14, %c0_15] : memref<32x32xf32, #tpu.memory_space<vmem>>, vector<32x32xf32>
    %c0_16 = arith.constant 0 : index
    %c0_17 = arith.constant 0 : index
    %19 = vector.load %arg9[%c0_16, %c0_17] : memref<32x384xf32, #tpu.memory_space<vmem>>, vector<32x384xf32>
    %cst_18 = arith.constant dense<0.000000e+00> : vector<32x384xf32>
    %20 = tpu.matmul %18, %19, %cst_18 {dimension_numbers = #tpu.dot_dimension_numbers<[1], [0], [0], [1], [0, 0, 1, 1], [], []>} : vector<32x32xf32>, vector<32x384xf32>, vector<32x384xf32> -> vector<32x384xf32>
    %c0_19 = arith.constant 0 : index
    %c0_20 = arith.constant 0 : index
    %21 = vector.load %arg11[%c0_19, %c0_20] : memref<1x384xf32, #tpu.memory_space<vmem>>, vector<1x384xf32>
    %22 = vector.broadcast %21 : vector<1x384xf32> to vector<32x384xf32>
    %23 = arith.addf %20, %22 : vector<32x384xf32>
    %24 = vector.extract_strided_slice %17 {offsets = [0, 0], sizes = [32, 32], strides = [1, 1]} : vector<32x384xf32> to vector<32x32xf32>
    %25 = vector.extract_strided_slice %23 {offsets = [0, 0], sizes = [32, 32], strides = [1, 1]} : vector<32x384xf32> to vector<32x32xf32>
    %26 = arith.addf %24, %25 : vector<32x32xf32>
    %27 = arith.negf %26 : vector<32x32xf32>
    %28 = math.exp %27 : vector<32x32xf32>
    %cst_21 = arith.constant 1.000000e+00 : f32
    %29 = vector.broadcast %cst_21 : f32 to vector<32x32xf32>
    %30 = arith.addf %29, %28 : vector<32x32xf32>
    %31 = arith.divf %29, %30 : vector<32x32xf32>
    %32 = vector.extract_strided_slice %17 {offsets = [0, 128], sizes = [32, 32], strides = [1, 1]} : vector<32x384xf32> to vector<32x32xf32>
    %33 = vector.extract_strided_slice %23 {offsets = [0, 128], sizes = [32, 32], strides = [1, 1]} : vector<32x384xf32> to vector<32x32xf32>
    %34 = arith.addf %32, %33 : vector<32x32xf32>
    %35 = arith.negf %34 : vector<32x32xf32>
    %36 = math.exp %35 : vector<32x32xf32>
    %cst_22 = arith.constant 1.000000e+00 : f32
    %37 = vector.broadcast %cst_22 : f32 to vector<32x32xf32>
    %38 = arith.addf %37, %36 : vector<32x32xf32>
    %39 = arith.divf %37, %38 : vector<32x32xf32>
    %40 = vector.extract_strided_slice %17 {offsets = [0, 256], sizes = [32, 32], strides = [1, 1]} : vector<32x384xf32> to vector<32x32xf32>
    %41 = vector.extract_strided_slice %23 {offsets = [0, 256], sizes = [32, 32], strides = [1, 1]} : vector<32x384xf32> to vector<32x32xf32>
    %42 = arith.mulf %31, %41 : vector<32x32xf32>
    %43 = arith.addf %40, %42 : vector<32x32xf32>
    %44 = math.tanh %43 : vector<32x32xf32>
    %cst_23 = arith.constant 1.000000e+00 : f32
    %45 = vector.broadcast %cst_23 : f32 to vector<32x32xf32>
    %46 = arith.subf %45, %39 : vector<32x32xf32>
    %47 = arith.mulf %46, %44 : vector<32x32xf32>
    %48 = arith.mulf %39, %18 : vector<32x32xf32>
    %49 = arith.addf %47, %48 : vector<32x32xf32>
    %c0_24 = arith.constant 0 : index
    %c0_25 = arith.constant 0 : index
    %50 = vector.load %arg14[%c0_24, %c0_25] : memref<32x32xf32, #tpu.memory_space<vmem>>, vector<32x32xf32>
    tpu.vector_store %arg14[%c0_24, %c0_25], %49 {strides = array<i32>} : memref<32x32xf32, #tpu.memory_space<vmem>>, vector<32x32xf32>,
    %c0_26 = arith.constant 0 : index
    %c0_27 = arith.constant 0 : index
    %51 = vector.load %arg4[%c0_26, %c0_27] : memref<32x16xf32, #tpu.memory_space<vmem>>, vector<32x16xf32>
    %c0_28 = arith.constant 0 : index
    %c0_29 = arith.constant 0 : index
    %52 = vector.load %arg12[%c0_28, %c0_29] : memref<16x32xf32, #tpu.memory_space<vmem>>, vector<16x32xf32>
    %cst_30 = arith.constant dense<0.000000e+00> : vector<32x32xf32>
    %53 = tpu.matmul %51, %52, %cst_30 {dimension_numbers = #tpu.dot_dimension_numbers<[1], [0], [0], [1], [0, 0, 1, 1], [], []>} : vector<32x16xf32>, vector<16x32xf32>, vector<32x32xf32> -> vector<32x32xf32>
    %54 = arith.addf %49, %53 : vector<32x32xf32>
    %c0_31 = arith.constant 0 : index
    %c0_32 = arith.constant 0 : index
    %55 = vector.load %arg13[%c0_31, %c0_32] : memref<1x32xf32, #tpu.memory_space<vmem>>, vector<1x32xf32>
    %56 = vector.broadcast %55 : vector<1x32xf32> to vector<32x32xf32>
    %57 = arith.addf %54, %56 : vector<32x32xf32>
    %c0_33 = arith.constant 0 : index
    %c0_34 = arith.constant 0 : index
    %58 = vector.load %arg15[%c0_33, %c0_34] : memref<32x32xf32, #tpu.memory_space<vmem>>, vector<32x32xf32>
    tpu.vector_store %arg15[%c0_33, %c0_34], %57 {strides = array<i32>} : memref<32x32xf32, #tpu.memory_space<vmem>>, vector<32x32xf32>,
    return
  }
  func.func @transform_0(%arg0: i32) -> (i32, i32) {
    %c0_i32 = arith.constant 0 : i32
    %c0_i32_0 = arith.constant 0 : i32
    return %arg0, %c0_i32 : i32, i32
  }
  func.func @transform_1(%arg0: i32) -> (i32, i32) {
    %c0_i32 = arith.constant 0 : i32
    %c0_i32_0 = arith.constant 0 : i32
    return %arg0, %c0_i32 : i32, i32
  }
  func.func @transform_2(%arg0: i32) -> (i32, i32) {
    %c0_i32 = arith.constant 0 : i32
    %c0_i32_0 = arith.constant 0 : i32
    return %arg0, %c0_i32 : i32, i32
  }
  func.func @transform_3(%arg0: i32) -> (i32, i32) {
    %c0_i32 = arith.constant 0 : i32
    %c0_i32_0 = arith.constant 0 : i32
    return %arg0, %c0_i32 : i32, i32
  }
  func.func @transform_4(%arg0: i32) -> (i32, i32) {
    %c0_i32 = arith.constant 0 : i32
    %c0_i32_0 = arith.constant 0 : i32
    %c0_i32_1 = arith.constant 0 : i32
    return %c0_i32, %c0_i32_0 : i32, i32
  }
  func.func @transform_5(%arg0: i32) -> (i32, i32) {
    %c0_i32 = arith.constant 0 : i32
    %c0_i32_0 = arith.constant 0 : i32
    %c0_i32_1 = arith.constant 0 : i32
    return %c0_i32, %c0_i32_0 : i32, i32
  }
  func.func @transform_6(%arg0: i32) -> (i32, i32) {
    %c0_i32 = arith.constant 0 : i32
    %c0_i32_0 = arith.constant 0 : i32
    %c0_i32_1 = arith.constant 0 : i32
    return %c0_i32, %c0_i32_0 : i32, i32
  }
  func.func @transform_7(%arg0: i32) -> (i32, i32) {
    %c0_i32 = arith.constant 0 : i32
    %c0_i32_0 = arith.constant 0 : i32
    %c0_i32_1 = arith.constant 0 : i32
    return %c0_i32, %c0_i32_0 : i32, i32
  }
  func.func @transform_8(%arg0: i32) -> (i32, i32) {
    %c0_i32 = arith.constant 0 : i32
    %c0_i32_0 = arith.constant 0 : i32
    %c0_i32_1 = arith.constant 0 : i32
    return %c0_i32, %c0_i32_0 : i32, i32
  }
  func.func @transform_9(%arg0: i32) -> (i32, i32) {
    %c0_i32 = arith.constant 0 : i32
    %c0_i32_0 = arith.constant 0 : i32
    %c0_i32_1 = arith.constant 0 : i32
    return %c0_i32, %c0_i32_0 : i32, i32
  }
  func.func @transform_10(%arg0: i32) -> (i32, i32) {
    %c0_i32 = arith.constant 0 : i32
    %c0_i32_0 = arith.constant 0 : i32
    %c0_i32_1 = arith.constant 0 : i32
    return %c0_i32, %c0_i32_0 : i32, i32
  }
  func.func @transform_11(%arg0: i32) -> (i32, i32) {
    %c0_i32 = arith.constant 0 : i32
    %c0_i32_0 = arith.constant 0 : i32
    %c0_i32_1 = arith.constant 0 : i32
    return %c0_i32, %c0_i32_0 : i32, i32
  }
  func.func @transform_12(%arg0: i32) -> (i32, i32) {
    %c0_i32 = arith.constant 0 : i32
    %c0_i32_0 = arith.constant 0 : i32
    %c0_i32_1 = arith.constant 0 : i32
    return %c0_i32, %c0_i32_0 : i32, i32
  }
  func.func @transform_13(%arg0: i32) -> (i32, i32) {
    %c0_i32 = arith.constant 0 : i32
    %c0_i32_0 = arith.constant 0 : i32
    return %arg0, %c0_i32 : i32, i32
  }
  func.func @transform_14(%arg0: i32) -> (i32, i32) {
    %c0_i32 = arith.constant 0 : i32
    %c0_i32_0 = arith.constant 0 : i32
    return %arg0, %c0_i32 : i32, i32
  }
}

</mosaic_0001>

<bundles_post_ra>
// kernel: gru_memory_updater.1
= control target key start
LH: loop header
LB: loop body
LE: loop exit
PB: predicated region body
PF: predicated region fallthrough
CT: control target
= control target key end

     0   :  { %s4301_s0 = inlined_call_operand.vmem [shape: f32[50,1], index: 0, kind: input, shape index: {}]   ;;  %s4302_s1 = inlined_call_operand.vmem [shape: f32[50,32], index: 1, kind: input, shape index: {}]   ;;  %s4303_s2 = inlined_call_operand.vmem [shape: f32[50,32], index: 2, kind: input, shape index: {}]   ;;  %s4304_s3 = inlined_call_operand.vmem [shape: f32[50,16], index: 3, kind: input, shape index: {}]   ;;  %s4305_s4 = inlined_call_operand.hbm [shape: f32[1,16], index: 4, kind: input, shape index: {}]   ;;  %s4306_s5 = inlined_call_operand.hbm [shape: f32[1,16], index: 5, kind: input, shape index: {}]   ;;  %s4307_s6 = inlined_call_operand.vmem [shape: f32[32,384], index: 6, kind: input, shape index: {}]   ;;  %s4308_s7 = inlined_call_operand.vmem [shape: f32[16,384], index: 7, kind: input, shape index: {}]   ;;  %s4309_s8 = inlined_call_operand.vmem [shape: f32[32,384], index: 8, kind: input, shape index: {}]   ;;  %s4310_s9 = inlined_call_operand.vmem [shape: f32[1,384], index: 9, kind: input, shape index: {}]   ;;  %s4311_s10 = inlined_call_operand.vmem [shape: f32[1,384], index: 10, kind: input, shape index: {}]   ;;  %s4312_s11 = inlined_call_operand.hbm [shape: f32[16,32], index: 11, kind: input, shape index: {}]   ;;  %s4313_s12 = inlined_call_operand.hbm [shape: f32[1,32], index: 12, kind: input, shape index: {}]   ;;  %s4314_s13 = inlined_call_operand.vmem [shape: f32[50,32], index: 13, kind: output, shape index: {0}]   ;;  %s4315_s14 = inlined_call_operand.vmem [shape: f32[50,32], index: 14, kind: output, shape index: {1}]  }
   0x1   :  { %4319 = sst [smem:[#allocation17_spill]] %s4305_s4 }
   0x2   :  { %4320 = sst [smem:[#allocation18_spill]] %s4306_s5 }
   0x3   :  { %4321 = sst [smem:[#allocation19_spill]] %s4314_s13 }
   0x4   :  { %4322 = sst [smem:[#allocation20_spill]] %s4315_s14 }
   0x5   :  { %20 = vsyncpa [#allocation3], 0 }
   0x6   :  { %21 = vsyncpa [#allocation5], 0 }
   0x7   :  { %22 = vsyncpa [#allocation8], 0  ;;  %s3217_s29 = smov 0   ;;  %s3219_s30 = smov 0  }
   0x8   :  { %s3221_s15 = smov 0  }
   0x9 LB: > { %4323 = sst [smem:[#allocation14_spill]] %s3059_s30  ;;  %s3230_s16 = sadd.s32 4294967295, %s3063_s15   ;;  %s3063_s15 = sphi %s3221_s15, %s4363_s15   ;;  %s3059_s30 = sphi %s3219_s30, %s4365_s30   ;;  %s3055_s29 = sphi %s3217_s29, %s4364_s29  }
   0xa   : > { %s3232_s17 = sadd.s32 1, %s3063_s15   ;;  %s328_s19 = sadd.s32 1, %s3059_s30 }
   0xb   : > { %4324 = sst [smem:[#allocation15_spill]] %s3232_s17  ;;  %s325_s18 = ssub.s32 %s3063_s15, %s3232_s17 }
   0xc   : > { %p326_p0 = scmp.eq.s32.totalorder %s325_s18, 0  ;;  %p338_p1 = scmp.ne.s32.totalorder %s3059_s30, %s3055_s29 }
   0xd   : > { %p339_p2 = scmp.eq.s32.totalorder %s3230_s16, 1  ;;  %p2475_p3 = scmp.ge.s32.totalorder %s3063_s15, 1 }
   0xe   : > { %s3240_s20 = scalar_select %p326_p0, %s3059_s30, %s328_s19  }
   0xf   : > { %p3242_p4 = por %p339_p2, %p338_p1  ;;  %p378_p5 = scmp.lt.s32.totalorder %s3063_s15, 3 }
  0x10   : > { %4325 = sst [smem:[#allocation16_spill]] %s3240_s20  ;;  %p2627_p6 = scmp.eq.s32.totalorder %s3230_s16, 0 }
  0x11   : > { %p3247_p7 = pnand %p2475_p3, %p378_p5  ;;  %s4328_s5 = sld [smem:[#allocation18_spill]] }
  0x12   : > { %s3129_s26 = smov [#allocation4]   ;;  %s4329_s4 = sld [smem:[#allocation17_spill]] }
  0x13   : > { %p2614_p8 = pneg %p3247_p7  ;;  %s404_s27 = sshll.u32 %s3129_s26, 4  ;;  %s405_s27 = int_to_ptr.vmem [resolvable:$true] %s404_s27 }
  0x14   : > { %s3130_s20 = smov [#allocation2]   ;;  %s3131_s28 = smov [#allocation6]  }
  0x15   : > { %p3261_p9 = pnand %p2627_p6, %p2614_p8  ;;  %s392_s26 = sshll.u32 %s3130_s20, 4  ;;  %s393_s26 = int_to_ptr.vmem [resolvable:$true] %s392_s26 }
  0x16   : > { %s430_s18 = sshll.u32 %s3131_s28, 4  ;;  %s443_s17 = sshll.u32 %s4313_s12, 4  ;;  %s431_s18 = int_to_ptr.vmem [resolvable:$true] %s430_s18  ;;  %s444_s17 = int_to_ptr.hbm [resolvable:$true] %s443_s17 }
  0x17   : > { %s402_s25 = sshll.u32 %s4328_s5, 4  ;;  %s428_s5 = sshll.u32 %s4312_s11, 4  ;;  %s403_s25 = int_to_ptr.hbm [resolvable:$true] %s402_s25  ;;  %s429_s5 = int_to_ptr.hbm [resolvable:$true] %s428_s5 }
  0x18   : > { %s390_s15 = sshll.u32 %s4329_s4, 4  ;;  %s3132_s14 = smov 128   ;;  %s391_s15 = int_to_ptr.hbm [resolvable:$true] %s390_s15 }
  0x19   : > { %2620 = dma.hbm_to_vmem [thread:$0]  (!%p3261_p9), %s403_s25, 16, %s405_s27, [#allocation5]  }
  0x1a   : > { %2617 = dma.hbm_to_vmem [thread:$0]  (!%p3261_p9), %s391_s15, 16, %s393_s26, [#allocation3]  }
  0x1b   : > { %s3133_s13 = smov 8   ;;  %s3134_s20 = smov [#allocation7]  }
  0x1c   : > { %2623 = dma.hbm_to_vmem [thread:$0]  (!%p3261_p9), %s429_s5, 256, %s431_s18, [#allocation5], %s3132_s14, %s3132_s14, %s3133_s13  }
  0x1d   : > { %s445_s23 = sshll.u32 %s3134_s20, 4  ;;  %526 = sbr.rel (%p3247_p7) target bundleno = 687 (0x2af), region = 72  ;;  %s446_s23 = int_to_ptr.vmem [resolvable:$true] %s445_s23 }
  0x1e   : > { %2626 = dma.hbm_to_vmem [thread:$0]  (!%p3261_p9), %s444_s17, 16, %s446_s23, [#allocation8]  }
  0x22   : > { %3042 = dma.done.wait (%p2627_p6), [#allocation3], 16  }
  0x23   : > { %3044 = vsyncadd (%p2627_p6), [#allocation3], 4294967280 }
  0x24   : > { %3046 = dma.done.wait (%p2627_p6), [#allocation5], 272  }
  0x25   : > { %3048 = vsyncadd (%p2627_p6), [#allocation5], 4294967024 }
  0x26   : > { %3050 = dma.done.wait (%p2627_p6), [#allocation8], 16  }
  0x27   : > { %3052 = vsyncadd (%p2627_p6), [#allocation8], 4294967280  ;;  %s3294_s4 = sshll.u32 %s3230_s16, 2  ;;  %v3135_v0 = vmov 0   ;;  %v1363_v5 = vld [vmem:[%s4308_s7 + $0x18] sm:$0xff]  ;;  %v1364_v6 = vld [vmem:[%s4308_s7 + $0x20] sm:$0xff] }
  0x28   : > { %2801 = vset.pattern.permute.xlu1 %v3135_v0  ;;  %2800 = vset.pattern.permute.xlu0 %v3135_v0  ;;  %p627_p10 = scmp.lt.s32.totalorder %s3294_s4, 6  ;;  %v1360_v7 = vld [vmem:[%s4308_s7] sm:$0xff]  ;;  %v1361_v8 = vld [vmem:[%s4308_s7 + $0x8] sm:$0xff]  ;;  %v3136_v40 = vmov 683565275   ;;  %s613_s14 = sand.u32 1, %s3055_s29  }
  0x29   : > { %1393 = vmatpush.msra.mxu0 %v1363_v5  ;;  %2594 = vmatpush.msra.mxu2 %v1363_v5  ;;  %v2802_v9 = vld [vmem:[#allocation2] ss:$0 sm:$0xff]  ;;  %v2803_v10 = vld [vmem:[#allocation4] ss:$0 sm:$0xff]  ;;  %v3137_v42 = vmov 2475754826  }
  0x2a   : > { %s628_s5 = scalar_select %p627_p10, %s3294_s4, 6  ;;  %1422 = vmatpush.msra.mxu1 %v1364_v6  ;;  %2596 = vmatpush.msra.mxu3 %v1364_v6  ;;  %v3138_v47 = vmov 2102212464   ;;  %v3139_v50 = vmov 2131351028  }
  0x2b   : > { %1394 = vmatpush.msra.mxu0 %v1360_v7  ;;  %2595 = vmatpush.msra.mxu2 %v1360_v7  ;;  %v3140_v54 = vmov 920167782   ;;  %v3141_v60 = vmov 1326507024   ;;  %s4108_s29 = sshll.u32 %s613_s14, 5  ;;  %s1976_s22 = ssub.s32 (%p3242_p4), 7, %s3294_s4 }
  0x2c   : > { %s3300_s13 = sshll.u32 %s628_s5, 3  ;;  %1423 = vmatpush.msra.mxu1 %v1361_v8  ;;  %2597 = vmatpush.msra.mxu3 %v1361_v8  ;;  %s4145_s30 = scalar_lea.vmem [#allocation9], %s4108_s29  }
  0x2d   : > { %s630_s17 = scalar_lea.vmem %s4301_s0, %s3300_s13  ;;  %s3812_s27 = scalar_lea.vmem %s4302_s1, %s3300_s13 }
  0x2e   : > { %v690_v1 = vld [vmem:[%s630_s17 + $0x10] sm:$0xff]  ;;  %v688_v2 = vld [vmem:[%s630_s17] sm:$0xff]  ;;  %v691_v3 = vld [vmem:[%s630_s17 + $0x18] sm:$0xff]  ;;  %s672_s19 = scalar_lea.vmem %s4304_s3, %s3300_s13  ;;  %s658_s28 = scalar_lea.vmem %s4303_s2, %s3300_s13 }
  0x2f   : > { %705 = vperm.xlu0 %2800, %v690_v1   ;;  %695 = vperm.xlu1 %2801, %v688_v2   ;;  %v689_v4 = vld [vmem:[%s630_s17 + $0x8] sm:$0xff]  ;;  %s4167_s17 = scalar_lea.vmem [#allocation10], %s4108_s29   ;;  %s2588_s25 = sshll.u32 (%p3242_p4), %s3230_s16, 5 }
  0x30   : > { %p1977_p11 = scmp.lt.s32.totalorder (%p3242_p4), %s1976_s22, 4  ;;  %s4355_s24 = sld [smem:[#allocation19_spill]] (%p3242_p4) }
  0x36   : > { %s4206_s26 = scalar_lea.vmem (%p3242_p4), %s4355_s24, %s2588_s25  }
  0x37   : > { %710 = vperm.xlu0 %2800, %v691_v3   ;;  %700 = vperm.xlu1 %2801, %v689_v4  }
  0xa1   : > { %v706_v11 = vpop.permute.xlu0 %705  ;;  %v696_v12 = vpop.permute.xlu1 %695 }
  0xa2   : > { %v718_v13 = vmul.f32 %v2802_v9, %v706_v11  ;;  %v716_v14 = vmul.f32 %v2802_v9, %v696_v12 }
  0xa4   : > { %v3318_v15 = vadd.f32 %v2803_v10, %v718_v13  ;;  %v3320_v16 = vadd.f32 %v2803_v10, %v716_v14 }
  0xa6   : > { %v1039_v17 = vand.u32 2139095040, %v3318_v15  ;;  %v731_v18 = vand.u32 2139095040, %v3320_v16  ;;  %v728_v19 = vand.u32 2147483647, %v3320_v16  ;;  %v1036_v24 = vand.u32 2147483647, %v3318_v15 }
  0xa8   : > { %v1040_v20 = vshrl.u32 %v1039_v17, 23  ;;  %v732_v21 = vshrl.u32 %v731_v18, 23  ;;  %v735_v27 = vand.u32 8388607, %v728_v19  ;;  %v1043_v32 = vand.u32 8388607, %v1036_v24 }
  0xa9   : > { %v711_v22 = vpop.permute.xlu0 %710  ;;  %v701_v23 = vpop.permute.xlu1 %700 }
  0xaa   : > { %v2496_v25 = vadd.s32 4294967169, %v732_v21  ;;  %v719_v26 = vmul.f32 %v2802_v9, %v711_v22  ;;  %v2502_v28 = vadd.s32 4294967169, %v1040_v20  ;;  %v717_v29 = vmul.f32 %v2802_v9, %v701_v23 }
  0xab   : > { %v736_v33 = vor.u32 8388608, %v735_v27  ;;  %v1044_v38 = vor.u32 8388608, %v1043_v32 }
  0xac   : > { %v738_v30 = vadd.s32 1, %v2496_v25  ;;  %v3328_v31 = vadd.f32 %v2803_v10, %v719_v26  ;;  %v1046_v34 = vadd.s32 1, %v2502_v28  ;;  %v3332_v36 = vadd.f32 %v2803_v10, %v717_v29 }
  0xad   : > { %v3336_v44 = vshll.u32 %v736_v33, 8  ;;  %v3349_v5 = vshll.u32 %v1044_v38, 8 }
  0xae   : > { %vm739_vm0 = vcmp.gt.s32.totalorder %v738_v30, 0  ;;  %vm1047_vm1 = vcmp.gt.s32.totalorder %v1046_v34, 0  ;;  %v885_v46 = vand.u32 2139095040, %v3332_v36  ;;  %v1193_v62 = vand.u32 2139095040, %v3328_v31 }
  0xaf   : > { %v740_v35 = vsel %vm739_vm0, %v738_v30, 0  ;;  %v1048_v57 = vsel %vm1047_vm1, %v1046_v34, 0  ;;  %v777_v4 = vand.u32 65535, %v3336_v44  ;;  %v778_v9 = vshrl.u32 %v3336_v44, 16 }
  0xb0   : > { %v742_v37 = vand.u32 31, %v740_v35  ;;  %v741_v45 = vshrl.u32 %v740_v35, 5  ;;  %v886_v63 = vshrl.u32 %v885_v46, 23  ;;  %v3351_v6 = vshrl.u32 %v1048_v57, 5 }
  0xb1   : > { %v3353_v7 = vand.u32 31, %v1048_v57  ;;  %v3358_v11 = vshrl.u32 %v1193_v62, 23  ;;  %v3362_v21 = vand.u32 65535, %v3349_v5  ;;  %v3373_v35 = vshrl.u32 %v3349_v5, 16 }
  0xb2   : > { %v743_v39 = vsub.s32 32, %v742_v37  ;;  %v745_v41 = vshll.u32 %v3136_v40, %v742_v37  ;;  %v748_v43 = vshll.u32 %v3137_v42, %v742_v37  ;;  %v754_v48 = vshll.u32 %v3138_v47, %v742_v37 }
  0xb3   : > { %v751_v52 = vshll.u32 %v3139_v50, %v742_v37  ;;  %v757_v56 = vshll.u32 %v3140_v54, %v742_v37  ;;  %vm760_vm2 = vcmp.lt.s32.totalorder %v741_v45, 1  ;;  %vm761_vm3 = vcmp.lt.s32.totalorder %v741_v45, 2 }
  0xb4   : > { %v746_v49 = vshrl.u32 %v3137_v42, %v743_v39  ;;  %v749_v51 = vshrl.u32 %v3139_v50, %v743_v39  ;;  %v752_v53 = vshrl.u32 %v3138_v47, %v743_v39  ;;  %v755_v55 = vshrl.u32 %v3140_v54, %v743_v39 }
  0xb5   : > { %v758_v61 = vshrl.u32 %v3141_v60, %v743_v39  ;;  %v744_v8 = vshrl.u32 %v3136_v40, %v743_v39  ;;  %vm762_vm4 = vcmp.lt.s32.totalorder %v741_v45, 3  ;;  %vm763_vm5 = vcmp.lt.s32.totalorder %v741_v45, 4 }
  0xb6   : > { %v747_v58 = vor.u32 %v746_v49, %v745_v41  ;;  %v750_v59 = vor.u32 %v749_v51, %v748_v43  ;;  %v756_v1 = vor.u32 %v755_v55, %v754_v48  ;;  %v753_v2 = vor.u32 %v752_v53, %v751_v52 }
  0xb7   : > { %v759_v3 = vor.u32 %v758_v61, %v757_v56  ;;  %v2499_v12 = vadd.s32 4294967169, %v886_v63  ;;  %v3367_v27 = vsub.s32 32, %v3353_v7  ;;  %v1053_v49 = vshll.u32 %v3136_v40, %v3353_v7 }
  0xb8   : > { %v768_v10 = vsel %vm760_vm2, %v747_v58, %v750_v59  ;;  %v765_v13 = vsel %vm763_vm5, %v753_v2, 2102212464  ;;  %v769_v14 = vsel %vm763_vm5, %v756_v1, 920167782  ;;  %v772_v18 = vsel %vm760_vm2, %v750_v59, %v753_v2 }
  0xb9   : > { %v770_v17 = vsel %vm762_vm4, %v753_v2, %v769_v14  ;;  %v773_v20 = vsel %vm763_vm5, %v759_v3, 1326507024  ;;  %v764_v22 = vsel %vm760_vm2, %v744_v8, %v747_v58  ;;  %v766_v23 = vsel %vm762_vm4, %v750_v59, %v765_v13 }
  0xba   : > { %v771_v25 = vsel %vm761_vm3, %v768_v10, %v770_v17  ;;  %v774_v26 = vsel %vm762_vm4, %v756_v1, %v773_v20  ;;  %v3370_v32 = vadd.s32 1, %v2499_v12  ;;  %v3376_v37 = vsel %vm761_vm3, %v764_v22, %v766_v23 }
  0xbb   : > { %v775_v28 = vsel %vm761_vm3, %v772_v18, %v774_v26  ;;  %v801_v29 = vand.u32 65535, %v771_v25  ;;  %v802_v30 = vshrl.u32 %v771_v25, 16  ;;  %v1054_v55 = vshrl.u32 %v3137_v42, %v3367_v27 }
  0xbc   : > { %v779_v33 = vand.u32 65535, %v775_v28  ;;  %v780_v34 = vshrl.u32 %v775_v28, 16  ;;  %v1057_v2 = vshrl.u32 %v3139_v50, %v3367_v27  ;;  %v1056_v12 = vshll.u32 %v3137_v42, %v3353_v7 }
  0xbd   : > { %v803_v38 = vmul.u32 %v801_v29, %v777_v4  ;;  %v804_v39 = vmul.u32 %v802_v30, %v777_v4  ;;  %v805_v41 = vmul.u32 %v801_v29, %v778_v9  ;;  %v806_v51 = vmul.u32 %v802_v30, %v778_v9 }
  0xbe   : > { %v781_v43 = vmul.u32 %v779_v33, %v777_v4  ;;  %v782_v46 = vmul.u32 %v780_v34, %v777_v4  ;;  %v783_v48 = vmul.u32 %v779_v33, %v778_v9  ;;  %v784_v56 = vmul.u32 %v780_v34, %v778_v9 }
  0xbf   : > { %v807_v52 = vshll.u32 %v804_v39, 16  ;;  %v809_v53 = vshll.u32 %v805_v41, 16  ;;  %v808_v58 = vshrl.u32 %v804_v39, 16  ;;  %v810_v61 = vshrl.u32 %v805_v41, 16 }
  0xc0   : > { %v785_v57 = vshll.u32 %v782_v46, 16  ;;  %v787_v45 = vshll.u32 %v783_v48, 16  ;;  %v786_v59 = vshrl.u32 %v782_v46, 16  ;;  %v3386_v8 = vor.u32 %v1054_v55, %v1053_v49 }
  0xc1   : > { %vm811_vm6 = vc.u32 %v803_v38, %v807_v52  ;;  %v813_v62 = vadd.s32 %v807_v52, %v803_v38  ;;  %v1059_v17 = vshll.u32 %v3139_v50, %v3353_v7  ;;  %v1060_v18 = vshrl.u32 %v3138_v47, %v3367_v27 }
  0xc2   : > { %vm789_vm7 = vc.u32 %v781_v43, %v785_v57  ;;  %v791_v63 = vadd.s32 %v785_v57, %v781_v43  ;;  %v812_v1 = vsel %vm811_vm6, 1, %v3135_v0  ;;  %v1058_v22 = vor.u32 %v1057_v2, %v1056_v12 }
  0xc3   : > { %v790_v3 = vsel %vm789_vm7, 1, %v3135_v0  ;;  %v814_v4 = vadd.s32 %v812_v1, %v806_v51  ;;  %vm815_vm8 = vc.u32 %v813_v62, %v809_v53  ;;  %v1062_v23 = vshll.u32 %v3138_v47, %v3353_v7 }
  0xc4   : > { %v792_v9 = vadd.s32 %v790_v3, %v784_v56  ;;  %vm793_vm9 = vc.u32 %v791_v63, %v787_v45  ;;  %v816_v10 = vsel %vm815_vm8, 1, %v3135_v0  ;;  %v1063_v25 = vshrl.u32 %v3140_v54, %v3367_v27 }
  0xc5   : > { %v794_v13 = vsel %vm793_vm9, 1, %v3135_v0  ;;  %v818_v14 = vadd.s32 %v816_v10, %v814_v4  ;;  %v1061_v28 = vor.u32 %v1060_v18, %v1059_v17  ;;  %v1065_v29 = vshll.u32 %v3140_v54, %v3353_v7 }
  0xc6   : > { %v796_v20 = vadd.s32 %v794_v13, %v792_v9  ;;  %v1066_v30 = vshrl.u32 %v3141_v60, %v3367_v27  ;;  %v788_v33 = vshrl.u32 %v783_v48, 16  ;;  %v3404_v38 = vadd.s32 %v813_v62, %v809_v53 }
  0xc7   : > { %v819_v26 = vadd.s32 %v818_v14, %v808_v58  ;;  %v1064_v39 = vor.u32 %v1063_v25, %v1062_v23  ;;  %vm1068_vm10 = vcmp.lt.s32.totalorder %v3351_v6, 1  ;;  %vm1071_vm11 = vcmp.lt.s32.totalorder %v3351_v6, 4 }
  0xc8   : > { %v797_v34 = vadd.s32 %v796_v20, %v786_v59  ;;  %v1067_v43 = vor.u32 %v1066_v30, %v1065_v29  ;;  %vm1070_vm12 = vcmp.lt.s32.totalorder %v3351_v6, 3  ;;  %v1076_v7 = vsel %vm1068_vm10, %v3386_v8, %v1058_v22 }
  0xc9   : > { %v820_v41 = vadd.s32 %v819_v26, %v810_v61  ;;  %v1077_v48 = vsel %vm1071_vm11, %v1064_v39, 920167782  ;;  %vm893_vm13 = vcmp.gt.s32.totalorder %v3370_v32, 0  ;;  %vm1069_vm14 = vcmp.lt.s32.totalorder %v3351_v6, 2 }
  0xca   : > { %v798_v46 = vadd.s32 %v797_v34, %v788_v33  ;;  %v1078_v51 = vsel %vm1070_vm12, %v1061_v28, %v1077_v48  ;;  %v821_v52 = vmul.u32 %v3336_v44, %v3376_v37  ;;  %v1080_v55 = vsel %vm1068_vm10, %v1058_v22, %v1061_v28 }
  0xcb   : > { %v824_v49 = vadd.s32 1, %v820_v41  ;;  %v1079_v53 = vsel %vm1069_vm14, %v1076_v7, %v1078_v51  ;;  %v1081_v57 = vsel %vm1071_vm11, %v1067_v43, 1326507024  ;;  %v894_v59 = vsel %vm893_vm13, %v3370_v32, 0 }
  0xcc   : > { %vm823_vm15 = vc.u32 %v798_v46, %v3404_v38  ;;  %v1109_v45 = vand.u32 65535, %v1079_v53  ;;  %v1110_v58 = vshrl.u32 %v1079_v53, 16  ;;  %v1082_v44 = vsel %vm1070_vm12, %v1064_v39, %v1081_v57 }
  0xcd   : > { %v825_v56 = vsel %vm823_vm15, %v824_v49, %v820_v41  ;;  %v1083_v37 = vsel %vm1069_vm14, %v1080_v55, %v1082_v44  ;;  %v2505_v4 = vadd.s32 4294967169, %v3358_v11  ;;  %v3435_v9 = vand.u32 31, %v894_v59 }
  0xce   : > { %v826_v61 = vadd.s32 %v825_v56, %v821_v52  ;;  %v1112_v62 = vmul.u32 %v1110_v58, %v3362_v21  ;;  %v1113_v63 = vmul.u32 %v1109_v45, %v3373_v35  ;;  %v1087_v2 = vand.u32 65535, %v1083_v37 }
  0xcf   : > { %v1088_v3 = vshrl.u32 %v1083_v37, 16  ;;  %v1111_v32 = vmul.u32 %v1109_v45, %v3362_v21  ;;  %v1052_v13 = vshrl.u32 %v3136_v40, %v3367_v27  ;;  %v1073_v14 = vsel %vm1071_vm11, %v1061_v28, 2102212464 }
  0xd0   : > { %v827_v1 = vadd.s32 536870912, %v826_v61  ;;  %v1115_v10 = vshll.u32 %v1112_v62, 16  ;;  %v1091_v18 = vmul.u32 %v1087_v2, %v3373_v35  ;;  %v1117_v20 = vshll.u32 %v1113_v63, 16 }
  0xd1   : > { %v1090_v17 = vmul.u32 %v1088_v3, %v3362_v21  ;;  %v1072_v25 = vsel %vm1068_vm10, %v1052_v13, %v3386_v8  ;;  %v1089_v26 = vmul.u32 %v1087_v2, %v3362_v21  ;;  %v1074_v27 = vsel %vm1070_vm12, %v1058_v22, %v1073_v14 }
  0xd2   : > { %v3438_v12 = vshrl.u32 %v827_v1, 30  ;;  %vm1119_vm0 = vc.u32 %v1111_v32, %v1115_v10  ;;  %v1121_v11 = vadd.s32 %v1115_v10, %v1111_v32  ;;  %v1114_v28 = vmul.u32 %v1110_v58, %v3373_v35 }
  0xd3   : > { %v1093_v29 = vshll.u32 %v1090_v17, 16  ;;  %v1120_v30 = vsel %vm1119_vm0, 1, %v3135_v0  ;;  %v1092_v34 = vmul.u32 %v1088_v3, %v3373_v35  ;;  %v1095_v41 = vshll.u32 %v1091_v18, 16 }
  0xd4   : > { %v829_v23 = vshll.u32 %v3438_v12, 30  ;;  %vm1123_vm1 = vc.u32 %v1121_v11, %v1117_v20  ;;  %v1122_v8 = vadd.s32 %v1120_v30, %v1114_v28  ;;  %v1200_v7 = vadd.s32 1, %v2505_v4 }
  0xd5   : > { %vm1097_vm2 = vc.u32 %v1089_v26, %v1093_v29  ;;  %v1099_v39 = vadd.s32 %v1093_v29, %v1089_v26  ;;  %v1124_v21 = vsel %vm1123_vm1, 1, %v3135_v0  ;;  %v3458_v49 = vshrl.u32 %v894_v59, 5 }
  0xd6   : > { %v830_v33 = vsub.s32 %v826_v61, %v829_v23  ;;  %v1098_v43 = vsel %vm1097_vm2, 1, %v3135_v0  ;;  %v1116_v51 = vshrl.u32 %v1112_v62, 16  ;;  %v1126_v52 = vadd.s32 %v1124_v21, %v1122_v8 }
  0xd7   : > { %v1100_v22 = vadd.s32 %v1098_v43, %v1092_v34  ;;  %vm1101_vm4 = vc.u32 %v1099_v39, %v1095_v41  ;;  %v3461_v53 = vsub.s32 32, %v3435_v9  ;;  %v822_v35 = vadd.s32 %v3404_v38, %v798_v46 }
  0xd8   : > { %vm831_vm3 = vcmp.lt.s32.totalorder %v830_v33, 0  ;;  %v832_v48 = vsub.s32 0, %v830_v33  ;;  %v1075_v56 = vsel %vm1069_vm14, %v1072_v25, %v1074_v27  ;;  %v1102_v45 = vsel %vm1101_vm4, 1, %v3135_v0 }
  0xd9   : > { %v1118_v58 = vshrl.u32 %v1113_v63, 16  ;;  %v1127_v61 = vadd.s32 %v1126_v52, %v1116_v51  ;;  %vm1201_vm5 = vcmp.gt.s32.totalorder %v1200_v7, 0  ;;  %v1094_v59 = vshrl.u32 %v1090_v17, 16 }
  0xda   : > { %v833_v55 = vsel %vm831_vm3, %v832_v48, %v830_v33  ;;  %v1096_v44 = vshrl.u32 %v1091_v18, 16  ;;  %v1104_v37 = vadd.s32 %v1102_v45, %v1100_v22  ;;  %v882_v62 = vand.u32 2147483647, %v3332_v36 }
  0xdb   : > { %v834_v57 = vclz %v833_v55  ;;  %v3468_v2 = vadd.s32 %v1121_v11, %v1117_v20  ;;  %v1128_v3 = vadd.s32 %v1127_v61, %v1118_v58  ;;  %v899_v38 = vshll.u32 %v3136_v40, %v3435_v9 }
  0xdc   : > { %v1105_v6 = vadd.s32 %v1104_v37, %v1094_v59  ;;  %v900_v46 = vshrl.u32 %v3137_v42, %v3461_v53  ;;  %v902_v63 = vshll.u32 %v3137_v42, %v3435_v9  ;;  %v903_v4 = vshrl.u32 %v3139_v50, %v3461_v53 }
  0xdd   : > { %v2497_v1 = vadd.s32 4294967294, %v834_v57  ;;  %v1132_v32 = vadd.s32 1, %v1128_v3  ;;  %v905_v10 = vshll.u32 %v3139_v50, %v3435_v9  ;;  %v908_v13 = vshll.u32 %v3138_v47, %v3435_v9 }
  0xde   : > { %v3482_v17 = vadd.s32 %v1105_v6, %v1096_v44  ;;  %v906_v18 = vshrl.u32 %v3138_v47, %v3461_v53  ;;  %v909_v20 = vshrl.u32 %v3140_v54, %v3461_v53  ;;  %v1129_v25 = vmul.u32 %v3349_v5, %v1075_v56 }
  0xdf   : > { %vm2498_vm6 = vcmp.lt.s32.totalorder %v2497_v1, 0  ;;  %v889_v26 = vand.u32 8388607, %v882_v62  ;;  %v911_v28 = vshll.u32 %v3140_v54, %v3435_v9  ;;  %v912_v41 = vshrl.u32 %v3141_v60, %v3461_v53 }
  0xe0   : > { %v837_v14 = vsel %vm2498_vm6, 0, %v2497_v1  ;;  %vm1131_vm7 = vc.u32 %v3482_v17, %v3468_v2  ;;  %v910_v27 = vor.u32 %v909_v20, %v908_v13  ;;  %v3497_v8 = vor.u32 %v900_v46, %v899_v38 }
  0xe1   : > { %v838_v11 = vsub.s32 32, %v837_v14  ;;  %v842_v23 = vsub.s32 4294967266, %v837_v14  ;;  %v839_v29 = vshll.u32 %v830_v33, %v837_v14  ;;  %v1133_v39 = vsel %vm1131_vm7, %v1132_v32, %v1128_v3 }
  0xe2   : > { %v1134_v43 = vadd.s32 %v1133_v39, %v1129_v25  ;;  %v3499_v5 = vor.u32 %v903_v4, %v902_v63  ;;  %v3501_v21 = vor.u32 %v906_v18, %v905_v10  ;;  %v913_v22 = vor.u32 %v912_v41, %v911_v28 }
  0xe3   : > { %v840_v30 = vshrl.u32 %v822_v35, %v838_v11  ;;  %v843_v34 = vadd.s32 127, %v842_v23  ;;  %vm914_vm8 = vcmp.lt.s32.totalorder %v3458_v49, 1  ;;  %v890_v9 = vor.u32 8388608, %v889_v26 }
  0xe4   : > { %v1135_v51 = vadd.s32 536870912, %v1134_v43  ;;  %vm916_vm9 = vcmp.lt.s32.totalorder %v3458_v49, 3  ;;  %vm917_vm10 = vcmp.lt.s32.totalorder %v3458_v49, 4  ;;  %v1202_v52 = vsel %vm1201_vm5, %v1200_v7, 0 }
  0xe5   : > { %v841_v33 = vor.u32 %v840_v30, %v839_v29  ;;  %v844_v48 = vshll.u32 %v843_v34, 23  ;;  %v852_v55 = vsub.s32 4, %v3438_v12  ;;  %v923_v56 = vsel %vm917_vm10, %v910_v27, 920167782 }
  0xe6   : > { %v3510_v57 = vshrl.u32 %v1135_v51, 30  ;;  %vm915_vm11 = vcmp.lt.s32.totalorder %v3458_v49, 2  ;;  %v922_v45 = vsel %vm914_vm8, %v3497_v8, %v3499_v5  ;;  %v926_v7 = vsel %vm914_vm8, %v3499_v5, %v3501_v21 }
  0xe7   : > { %v845_v35 = vor.u32 4788187, %v844_v48  ;;  %v848_v61 = vcvt.s32.f32 %v841_v33  ;;  %v924_v59 = vsel %vm916_vm9, %v3501_v21, %v923_v56  ;;  %v927_v44 = vsel %vm917_vm10, %v913_v22, 1326507024 }
  0xe8   : > { %vm730_vm12 = vcmp.lt.s32.totalorder %v3320_v16, 0  ;;  %v1137_v37 = vshll.u32 %v3510_v57, 30  ;;  %v928_v1 = vsel %vm916_vm9, %v910_v27, %v927_v44  ;;  %v3530_v3 = vshll.u32 %v890_v9, 8 }
  0xe9   : > { %v846_v58 = vand.u32 2147483647, %v845_v35  ;;  %v3532_v38 = vand.u32 31, %v1202_v52  ;;  %v853_v46 = vsel %vm730_vm12, %v852_v55, %v3438_v12  ;;  %v929_v63 = vsel %vm915_vm11, %v926_v7, %v928_v1 }
  0xea   : > { %v3539_v4 = vshrl.u32 %v1202_v52, 5  ;;  %vm3543_vm13 = vcmp.le.f32.partialorder %v728_v19, 0.7853982  ;;  %v3547_v10 = vsub.s32 %v1134_v43, %v1137_v37  ;;  %v3551_v13 = vsel %vm915_vm11, %v922_v45, %v924_v59 }
  0xeb   : > { %v849_v6 = vmul.f32 %v848_v61, %v846_v58  ;;  %v931_v12 = vand.u32 65535, %v3530_v3  ;;  %v933_v18 = vand.u32 65535, %v929_v63  ;;  %v934_v20 = vshrl.u32 %v929_v63, 16 }
  0xec   : > { %v855_v11 = vsel %vm3543_vm13, 0, %v853_v46  ;;  %vm1139_vm14 = vcmp.lt.s32.totalorder %v3547_v10, 0  ;;  %v1140_v19 = vsub.s32 0, %v3547_v10  ;;  %v932_v23 = vshrl.u32 %v3530_v3, 16 }
  0xed   : > { %v850_v14 = vxor.u32 2147483648, %v849_v6  ;;  %v3560_v25 = vsub.s32 32, %v3532_v38  ;;  %v3564_v29 = vmul.u32 %v934_v20, %v931_v12  ;;  %v956_v27 = vshrl.u32 %v3551_v13, 16 }
  0xee   : > { %v1141_v30 = vsel %vm1139_vm14, %v1140_v19, %v3547_v10  ;;  %v3573_v34 = vmul.u32 %v933_v18, %v932_v23  ;;  %v955_v39 = vand.u32 65535, %v3551_v13  ;;  %v3578_v43 = vand.u32 3, %v855_v11 }
  0xef   : > { %v851_v26 = vsel %vm730_vm12, %v850_v14, %v849_v6  ;;  %v1142_v33 = vclz %v1141_v30  ;;  %v898_v48 = vshrl.u32 %v3136_v40, %v3461_v53  ;;  %v1130_v22 = vadd.s32 %v3468_v2, %v3482_v17 }
  0xf0   : > { %v3570_v28 = vsel %vm3543_vm13, %v3320_v16, %v851_v26  ;;  %v935_v51 = vmul.u32 %v933_v18, %v931_v12  ;;  %v938_v9 = vmul.u32 %v934_v20, %v932_v23  ;;  %v939_v52 = vshll.u32 %v3564_v29, 16 }
  0xf1   : > { %v856_v41 = vmul.f32 %v3570_v28, %v3570_v28  ;;  %v2503_v56 = vadd.s32 4294967294, %v1142_v33  ;;  %v3585_v45 = vmul.u32 %v956_v27, %v931_v12  ;;  %v941_v7 = vshll.u32 %v3573_v34, 16 }
  0xf2   : > { %vm943_vm15 = vc.u32 %v935_v51, %v939_v52  ;;  %v945_v58 = vadd.s32 %v939_v52, %v935_v51  ;;  %v3588_v61 = vmul.u32 %v955_v39, %v932_v23  ;;  %v919_v63 = vsel %vm917_vm10, %v3501_v21, 2102212464 }
  0xf3   : > { %v857_v35 = vmul.f32 -0.001358992, %v856_v41  ;;  %v864_v55 = vmul.f32 -0.00019511016, %v856_v41  ;;  %vm2504_vm0 = vcmp.lt.s32.totalorder %v2503_v56, 0  ;;  %v944_v2 = vsel %vm943_vm15, 1, %v3135_v0 }
  0xf4   : > { %v1145_v17 = vsel %vm2504_vm0, 0, %v2503_v56  ;;  %v946_v44 = vadd.s32 %v944_v2, %v938_v9  ;;  %vm947_vm1 = vc.u32 %v945_v58, %v941_v7  ;;  %v961_v37 = vshll.u32 %v3585_v45, 16  ;;  %v1365_v56 = vld [vmem:[%s4308_s7 + $0x28] sm:$0xff] }
  0xf5   : > { %v858_v59 = vadd.f32 0.041655596, %v857_v35  ;;  %v865_v53 = vadd.f32 0.008332121, %v864_v55  ;;  %v1146_v46 = vsub.s32 32, %v1145_v17  ;;  %v1147_v32 = vshll.u32 %v3547_v10, %v1145_v17  ;;  %1451 = vmatpush.msrb.mxu2 %v1365_v56 }
  0xf6   : > { %v1150_v13 = vsub.s32 4294967266, %v1145_v17  ;;  %v948_v14 = vsel %vm947_vm1, 1, %v3135_v0  ;;  %v957_v18 = vmul.u32 %v955_v39, %v931_v12  ;;  %vm874_vm2 = vcmp.eq.s32.totalorder %v3578_v43, 0 }
  0xf7   : > { %v859_v1 = vmul.f32 %v858_v59, %v856_v41  ;;  %v866_v6 = vmul.f32 %v865_v53, %v856_v41  ;;  %v1148_v19 = vshrl.u32 %v1130_v22, %v1146_v46  ;;  %v950_v26 = vadd.s32 %v948_v14, %v946_v44 }
  0xf8   : > { %vm877_vm3 = vcmp.eq.s32.totalorder %v3578_v43, 2  ;;  %vm1038_vm4 = vcmp.lt.s32.totalorder %v3318_v15, 0  ;;  %v1151_v30 = vadd.s32 127, %v1150_v13  ;;  %v963_v33 = vshll.u32 %v3588_v61, 16 }
  0xf9   : > { %v860_v20 = vadd.f32 -0.4999988, %v859_v1  ;;  %v867_v11 = vadd.f32 -0.16666654, %v866_v6  ;;  %vm965_vm5 = vc.u32 %v957_v18, %v961_v37  ;;  %v967_v21 = vadd.s32 %v961_v37, %v957_v18 }
  0xfa   : > { %vm873_vm6 = vcmp.lt.s32.totalorder %v3578_v43, 2  ;;  %v940_v12 = vshrl.u32 %v3564_v29, 16  ;;  %v960_v39 = vmul.u32 %v956_v27, %v932_v23  ;;  %vm871_vm7 = vweird.f32 %v3320_v16 }
  0xfb   : > { %v861_v10 = vmul.f32 %v860_v20, %v856_v41  ;;  %v868_v51 = vmul.f32 %v867_v11, %v856_v41  ;;  %v1149_v22 = vor.u32 %v1148_v19, %v1147_v32  ;;  %v1152_v9 = vshll.u32 %v1151_v30, 23 }
  0xfc   : > { %v966_v52 = vsel %vm965_vm5, 1, %v3135_v0  ;;  %vm969_vm10 = vc.u32 %v967_v21, %v963_v33  ;;  %v918_v41 = vsel %vm914_vm8, %v898_v48, %v3497_v8  ;;  %v951_v7 = vadd.s32 %v950_v26, %v940_v12 }
  0xfd   : > { %v862_v35 = vadd.f32 1.0, %v861_v10  ;;  %v869_v55 = vadd.f32 1.0, %v868_v51  ;;  %vm3613_vm12 = vcmp.le.f32.partialorder %v1036_v24, 0.7853982  ;;  %v1153_v29 = vor.u32 4788187, %v1152_v9 }
  0xfe   : > { %v920_v27 = vsel %vm916_vm9, %v3499_v5, %v919_v63  ;;  %v968_v58 = vadd.s32 %v966_v52, %v960_v39  ;;  %v970_v59 = vsel %vm969_vm10, 1, %v3135_v0  ;;  %v1160_v8 = vsub.s32 4, %v3510_v57 }
  0xff   : > { %v870_v53 = vmul.f32 %v869_v55, %v3570_v28  ;;  %v878_v2 = vxor.u32 2147483648, %v862_v35  ;;  %v942_v48 = vshrl.u32 %v3573_v34, 16  ;;  %v1154_v24 = vand.u32 2147483647, %v1153_v29 }
 0x100   : > { %v1156_v17 = vcvt.s32.f32 %v1149_v22  ;;  %v962_v44 = vshrl.u32 %v3585_v45, 16  ;;  %v972_v37 = vadd.s32 %v970_v59, %v968_v58  ;;  %v921_v6 = vsel %vm915_vm11, %v918_v41, %v920_v27 }
 0x101   : > { %v875_v1 = vxor.u32 2147483648, %v870_v53  ;;  %v3627_v5 = vadd.s32 %v951_v7, %v942_v48  ;;  %v1190_v46 = vand.u32 2147483647, %v3328_v31  ;;  %vm1366_vm8 = vcmask 130048  }
 0x102   : > { %v1157_v28 = vmul.f32 %v1156_v17, %v1154_v24  ;;  %v964_v63 = vshrl.u32 %v3588_v61, 16  ;;  %v973_v32 = vadd.s32 %v972_v37, %v962_v44  ;;  %v879_v45 = vsel %vm877_vm3, %v878_v2, %v870_v53 }
 0x103   : > { %v876_v34 = vsel %vm874_vm2, %v862_v35, %v875_v1  ;;  %v1161_v49 = vsel %vm1038_vm4, %v1160_v8, %v3510_v57  ;;  %v3638_v13 = vadd.s32 %v967_v21, %v963_v33  ;;  %v975_v61 = vmul.u32 %v3530_v3, %v921_v6 }
 0x104   : > { %v880_v14 = vsel %vm873_vm6, %v876_v34, %v879_v45  ;;  %v1158_v18 = vxor.u32 2147483648, %v1157_v28  ;;  %v974_v20 = vadd.s32 %v973_v32, %v964_v63  ;;  %v1197_v19 = vand.u32 8388607, %v1190_v46 }
 0x105   : > { %v3645_v11 = vsel %vm871_vm7, nan, %v880_v14  ;;  %vm977_vm9 = vc.u32 %v3627_v5, %v3638_v13  ;;  %v1211_v57 = vshrl.u32 %v3139_v50, %v3560_v25  ;;  %v1210_v3 = vshll.u32 %v3137_v42, %v3532_v38 }
 0x106   : > { %2508 = vmatmul.msk.f32.vlgmr.msra.gmra.mxu0 %vm1366_vm8, %v3645_v11  ;;  %v1159_v43 = vsel %vm1038_vm4, %v1158_v18, %v1157_v28  ;;  %2512 = vmatmul.msk.f32.vlgmr.msra.gmra.mxu1 %vm1366_vm8, %v3645_v11  ;;  %v978_v16 = vadd.s32 1, %v974_v20  ;;  %v1214_v26 = vshrl.u32 %v3138_v47, %v3560_v25  ;;  %v1213_v33 = vshll.u32 %v3139_v50, %v3532_v38 }
 0x107   : > { %v1162_v30 = vsel %vm3613_vm12, %v3318_v15, %v1159_v43  ;;  %v1216_v21 = vshll.u32 %v3138_v47, %v3532_v38  ;;  %v1217_v10 = vshrl.u32 %v3140_v54, %v3560_v25  ;;  %v1219_v39 = vshll.u32 %v3140_v54, %v3532_v38 }
 0x108   : > { %v1164_v51 = vmul.f32 %v1162_v30, %v1162_v30  ;;  %v979_v12 = vsel %vm977_vm9, %v978_v16, %v974_v20  ;;  %v1220_v22 = vshrl.u32 %v3141_v60, %v3560_v25  ;;  %v1208_v52 = vshrl.u32 %v3137_v42, %v3560_v25 }
 0x109   : > { %v980_v9 = vadd.s32 %v979_v12, %v975_v61  ;;  %v3678_v35 = vor.u32 %v1211_v57, %v1210_v3  ;;  %v3680_v50 = vor.u32 %v1214_v26, %v1213_v33  ;;  %v1218_v56 = vor.u32 %v1217_v10, %v1216_v21 }
 0x10a   : > { %v1165_v47 = vmul.f32 -0.001358992, %v1164_v51  ;;  %v1172_v55 = vmul.f32 -0.00019511016, %v1164_v51  ;;  %v1221_v41 = vor.u32 %v1220_v22, %v1219_v39  ;;  %v1163_v7 = vsel %vm3613_vm12, 0, %v1161_v49 }
 0x10b   : > { %v981_v29 = vadd.s32 536870912, %v980_v9  ;;  %v1198_v54 = vor.u32 8388608, %v1197_v19  ;;  %v1207_v60 = vshll.u32 %v3136_v40, %v3532_v38  ;;  %vm1222_vm11 = vcmp.lt.s32.totalorder %v3539_v4, 1 }
 0x10c   : > { %v1166_v27 = vadd.f32 0.041655596, %v1165_v47  ;;  %v1173_v58 = vadd.f32 0.008332121, %v1172_v55  ;;  %vm1225_vm13 = vcmp.lt.s32.totalorder %v3539_v4, 4  ;;  %v1234_v23 = vsel %vm1222_vm11, %v3678_v35, %v3680_v50 }
 0x10d   : > { %v3688_v42 = vshrl.u32 %v981_v29, 30  ;;  %v3690_v59 = vor.u32 %v1208_v52, %v1207_v60  ;;  %v1235_v53 = vsel %vm1225_vm13, %v1221_v41, 1326507024  ;;  %vm1224_vm14 = vcmp.lt.s32.totalorder %v3539_v4, 3 }
 0x10e   : > { %v1167_v2 = vmul.f32 %v1166_v27, %v1164_v51  ;;  %v1174_v38 = vmul.f32 %v1173_v58, %v1164_v51  ;;  %v1231_v8 = vsel %vm1225_vm13, %v1218_v56, 920167782  ;;  %v1180_v48 = vand.u32 3, %v1163_v7 }
 0x10f   : > { %v983_v24 = vshll.u32 %v3688_v42, 30  ;;  %vm1223_vm15 = vcmp.lt.s32.totalorder %v3539_v4, 2  ;;  %v1236_v17 = vsel %vm1224_vm14, %v1218_v56, %v1235_v53  ;;  %v3707_v6 = vshll.u32 %v1198_v54, 8 }
 0x110   : > { %v1168_v44 = vadd.f32 -0.4999988, %v1167_v2  ;;  %v1175_v37 = vadd.f32 -0.16666654, %v1174_v38  ;;  %v1237_v1 = vsel %vm1223_vm15, %v1234_v23, %v1236_v17  ;;  %v1230_v63 = vsel %vm1222_vm11, %v3690_v59, %v3678_v35 }
 0x111   : > { %v984_v28 = vsub.s32 %v980_v9, %v983_v24  ;;  %v1232_v32 = vsel %vm1224_vm14, %v3680_v50, %v1231_v8  ;;  %v1242_v34 = vshrl.u32 %v1237_v1, 16  ;;  %v1239_v14 = vand.u32 65535, %v3707_v6 }
 0x112   : > { %v1169_v45 = vmul.f32 %v1168_v44, %v1164_v51  ;;  %v1176_v49 = vmul.f32 %v1175_v37, %v1164_v51  ;;  %v1241_v18 = vand.u32 65535, %v1237_v1  ;;  %v1240_v57 = vshrl.u32 %v3707_v6, 16 }
 0x113   : > { %vm985_vm0 = vcmp.lt.s32.totalorder %v984_v28, 0  ;;  %v986_v20 = vsub.s32 0, %v984_v28  ;;  %v1244_v43 = vmul.u32 %v1242_v34, %v1239_v14  ;;  %vm1179_vm1 = vweird.f32 %v3318_v15 }
 0x114   : > { %v1170_v61 = vadd.f32 1.0, %v1169_v45  ;;  %v1177_v19 = vadd.f32 1.0, %v1176_v49  ;;  %vm1181_vm2 = vcmp.lt.s32.totalorder %v1180_v48, 2  ;;  %v1233_v3 = vsel %vm1223_vm15, %v1230_v63, %v1232_v32 }
 0x115   : > { %v987_v16 = vsel %vm985_vm0, %v986_v20, %v984_v28  ;;  %v1245_v10 = vmul.u32 %v1241_v18, %v1240_v57  ;;  %vm1182_vm3 = vcmp.eq.s32.totalorder %v1180_v48, 0  ;;  %vm1185_vm4 = vcmp.eq.s32.totalorder %v1180_v48, 2 }
 0x116   : > { %v1178_v26 = vmul.f32 %v1177_v19, %v1162_v30  ;;  %v1186_v33 = vxor.u32 2147483648, %v1170_v61  ;;  %v988_v21 = vclz %v987_v16  ;;  %v1243_v51 = vmul.u32 %v1241_v18, %v1239_v14 }
 0x117   : > { %v1247_v12 = vshll.u32 %v1244_v43, 16  ;;  %v1246_v9 = vmul.u32 %v1242_v34, %v1240_v57  ;;  %v1263_v52 = vand.u32 65535, %v1233_v3  ;;  %v1249_v47 = vshll.u32 %v1245_v10, 16 }
 0x118   : > { %v1183_v39 = vxor.u32 2147483648, %v1178_v26  ;;  %v2500_v22 = vadd.s32 4294967294, %v988_v21  ;;  %v1264_v56 = vshrl.u32 %v1233_v3, 16  ;;  %v1187_v7 = vsel %vm1185_vm4, %v1186_v33, %v1178_v26 }
 0x119   : > { %vm1251_vm5 = vc.u32 %v1243_v51, %v1247_v12  ;;  %v1253_v55 = vadd.s32 %v1247_v12, %v1243_v51  ;;  %v976_v58 = vadd.s32 %v3638_v13, %v3627_v5  ;;  %v1267_v8 = vmul.u32 %v1263_v52, %v1240_v57 }
 0x11a   : > { %v1184_v41 = vsel %vm1182_vm3, %v1170_v61, %v1183_v39  ;;  %vm2501_vm6 = vcmp.lt.s32.totalorder %v2500_v22, 0  ;;  %v1252_v30 = vsel %vm1251_vm5, 1, %v3135_v0  ;;  %v1266_v38 = vmul.u32 %v1264_v56, %v1239_v14 }
 0x11b   : > { %v1188_v29 = vsel %vm1181_vm2, %v1184_v41, %v1187_v7  ;;  %v991_v54 = vsel %vm2501_vm6, 0, %v2500_v22  ;;  %v1254_v60 = vadd.s32 %v1252_v30, %v1246_v9  ;;  %vm1255_vm7 = vc.u32 %v1253_v55, %v1249_v47 }
 0x11c   : > { %v3725_v27 = vsel %vm1179_vm1, nan, %v1188_v29  ;;  %v992_v23 = vsub.s32 32, %v991_v54  ;;  %v996_v53 = vsub.s32 4294967266, %v991_v54  ;;  %v1256_v2 = vsel %vm1255_vm7, 1, %v3135_v0 }
 0x11d   : > { %2510 = vmatmul.msk.f32.vlgmr.msra.gmra.mxu2 %vm1366_vm8, %v3725_v27  ;;  %2514 = vmatmul.msk.f32.vlgmr.msra.gmra.mxu3 %vm1366_vm8, %v3725_v27  ;;  %v993_v48 = vshll.u32 %v984_v28, %v991_v54  ;;  %v1258_v17 = vadd.s32 %v1256_v2, %v1254_v60  ;;  %v1265_v44 = vmul.u32 %v1263_v52, %v1239_v14  ;;  %v1269_v37 = vshll.u32 %v1266_v38, 16 }
 0x11e   : > { %v994_v24 = vshrl.u32 %v976_v58, %v992_v23  ;;  %v997_v15 = vadd.s32 127, %v996_v53  ;;  %v1248_v13 = vshrl.u32 %v1244_v43, 16  ;;  %v1268_v63 = vmul.u32 %v1264_v56, %v1240_v57 }
 0x11f   : > { %v1271_v32 = vshll.u32 %v1267_v8, 16  ;;  %vm1273_vm10 = vc.u32 %v1265_v44, %v1269_v37  ;;  %v1275_v34 = vadd.s32 %v1269_v37, %v1265_v44  ;;  %v1206_v20 = vshrl.u32 %v3136_v40, %v3560_v25 }
 0x120   : > { %v995_v1 = vor.u32 %v994_v24, %v993_v48  ;;  %v998_v5 = vshll.u32 %v997_v15, 23  ;;  %v1259_v49 = vadd.s32 %v1258_v17, %v1248_v13  ;;  %v1274_v18 = vsel %vm1273_vm10, 1, %v3135_v0 }
 0x121   : > { %v1227_v28 = vsel %vm1225_vm13, %v3680_v50, 2102212464  ;;  %v1276_v14 = vadd.s32 %v1274_v18, %v1268_v63  ;;  %vm1277_vm12 = vc.u32 %v1275_v34, %v1271_v32  ;;  %v1250_v43 = vshrl.u32 %v1245_v10, 16 }
 0x122   : > { %v999_v45 = vor.u32 4788187, %v998_v5  ;;  %v1002_v19 = vcvt.s32.f32 %v995_v1  ;;  %v1278_v57 = vsel %vm1277_vm12, 1, %v3135_v0  ;;  %v1270_v16 = vshrl.u32 %v1266_v38, 16 }
 0x123   : > { %v1280_v3 = vadd.s32 %v1278_v57, %v1276_v14  ;;  %v1226_v33 = vsel %vm1222_vm11, %v1206_v20, %v3690_v59  ;;  %v1228_v40 = vsel %vm1224_vm14, %v3678_v35, %v1227_v28  ;;  %v1260_v25 = vadd.s32 %v1259_v49, %v1250_v43 }
 0x124   : > { %v1000_v61 = vand.u32 2147483647, %v999_v45  ;;  %v1272_v50 = vshrl.u32 %v1267_v8, 16  ;;  %v1279_v12 = vadd.s32 %v1275_v34, %v1271_v32  ;;  %vm884_vm9 = vcmp.lt.s32.totalorder %v3332_v36, 0 }
 0x125   : > { %v1281_v21 = vadd.s32 %v1280_v3, %v1270_v16  ;;  %v1229_v0 = vsel %vm1223_vm15, %v1226_v33, %v1228_v40  ;;  %vm3752_vm13 = vcmp.le.f32.partialorder %v882_v62, 0.7853982  ;;  %v1006_v62 = vsub.s32 4, %v3688_v42  ;;  %v1357_v3 = vld [vmem:[%s4307_s6 + $0x48] sm:$0xff]  ;;  %v1354_v40 = vld [vmem:[%s4307_s6 + $0x30] sm:$0xff] }
 0x126   : > { %v1003_v26 = vmul.f32 %v1002_v19, %v1000_v61  ;;  %vm1285_vm11 = vc.u32 %v1260_v25, %v1279_v12  ;;  %v1283_v4 = vmul.u32 %v3707_v6, %v1229_v0  ;;  %vm1025_vm2 = vweird.f32 %v3332_v36  ;;  %1491 = vmatpush.msrb.mxu3 %v1357_v3  ;;  %v1359_v0 = vld [vmem:[%s4307_s6 + $0x58] sm:$0xff]  ;;  %v1902_v3 = vld [vmem:[%s672_s19 + $0x8] sm:$0xff] }
 0x127   : > { %v1282_v10 = vadd.s32 %v1281_v21, %v1272_v50  ;;  %v1007_v58 = vsel %vm884_vm9, %v1006_v62, %v3688_v42  ;;  %v1284_v20 = vadd.s32 %v1279_v12, %v1260_v25  ;;  %v1355_v25 = vld [vmem:[%s4307_s6 + $0x38] sm:$0xff]  ;;  %v1352_v12 = vld [vmem:[%s4307_s6 + $0x20] sm:$0xff]  ;;  %1549 = vmatpush.msrb.mxu1 %v1359_v0  ;;  %vm1192_vm4 = vcmp.lt.s32.totalorder %v3328_v31, 0  ;;  %v1350_v62 = vld [vmem:[%s4307_s6 + $0x10] sm:$0xff] }
 0x128   : > { %v1004_v51 = vxor.u32 2147483648, %v1003_v26  ;;  %v1009_v2 = vsel %vm3752_vm13, 0, %v1007_v58  ;;  %v1351_v50 = vld [vmem:[%s4307_s6 + $0x18] sm:$0xff]  ;;  %1492 = vmatpush.msrb.mxu3 %v1354_v40  ;;  %vm1466_vm5 = vcmask 261120   ;;  %vm3826_vm6 = vcmp.le.f32.partialorder %v1190_v46, 0.7853982 }
 0x129   : > { %v1286_v22 = vadd.s32 1, %v1282_v10  ;;  %v1026_v44 = vand.u32 3, %v1009_v2  ;;  %v1345_v58 = vld [vmem:[%s3812_s27 + $0x8] sm:$0xff]  ;;  %v3934_v40 = vld [vmem:[%s658_s28 + $0x10] sm:$0xff] }
 0x12a   : > { %v1005_v35 = vsel %vm884_vm9, %v1004_v51, %v1003_v26  ;;  %v1358_v26 = vld [vmem:[%s4307_s6 + $0x50] sm:$0xff]  ;;  %1493 = vmatpush.msrb.mxu3 %v1351_v50  ;;  %vm1333_vm9 = vweird.f32 %v3328_v31  ;;  %v3943_v50 = vld [vmem:[%s658_s28 + $0x18] sm:$0xff] }
 0x12b   : > { %v1008_v59 = vsel %vm3752_vm13, %v3332_v36, %v1005_v35  ;;  %v1287_v52 = vsel %vm1285_vm11, %v1286_v22, %v1282_v10  ;;  %vm1028_vm15 = vcmp.eq.s32.totalorder %v1026_v44, 0  ;;  %vm1031_vm0 = vcmp.eq.s32.totalorder %v1026_v44, 2  ;;  %v1362_v36 = vld [vmem:[%s4308_s7 + $0x10] sm:$0xff]  ;;  %1520 = vmatpush.msrb.mxu0 %v1358_v26  ;;  %v1348_v10 = vld [vmem:[%s4307_s6] sm:$0xff]  ;;  %v1349_v35 = vld [vmem:[%s4307_s6 + $0x8] sm:$0xff] }
 0x12c   : > { %v1010_v9 = vmul.f32 %v1008_v59, %v1008_v59  ;;  %v1288_v56 = vadd.s32 %v1287_v52, %v1283_v4  ;;  %vm1027_vm1 = vcmp.lt.s32.totalorder %v1026_v44, 2  ;;  %1452 = vmatpush.msrb.mxu2 %v1362_v36  ;;  %1494 = vmatpush.msrb.mxu3 %v1348_v10  ;;  %v3816_v22 = vld [vmem:[%s3812_s27] sm:$0xff]  ;;  %v3925_v26 = vld [vmem:[%s658_s28 + $0x8] sm:$0xff] }
 0x12d   : > { %1521 = vmatpush.msrb.mxu0 %v1355_v25  ;;  %v1356_v4 = vld [vmem:[%s4307_s6 + $0x40] sm:$0xff]  ;;  %v1904_v25 = vld [vmem:[%s672_s19 + $0x18] sm:$0xff] }
 0x12e   : > { %v1011_v47 = vmul.f32 -0.001358992, %v1010_v9  ;;  %v1018_v55 = vmul.f32 -0.00019511016, %v1010_v9  ;;  %v1289_v30 = vadd.s32 536870912, %v1288_v56  ;;  %1550 = vmatpush.msrb.mxu1 %v1356_v4  ;;  %v3916_v36 = vld [vmem:[%s658_s28] sm:$0xff] }
 0x12f   : > { %1522 = vmatpush.msrb.mxu0 %v1352_v12 }
 0x130   : > { %v1012_v41 = vadd.f32 0.041655596, %v1011_v47  ;;  %v1019_v7 = vadd.f32 0.008332121, %v1018_v55  ;;  %v3763_v60 = vshrl.u32 %v1289_v30, 30  ;;  %v1353_v55 = vld [vmem:[%s4307_s6 + $0x28] sm:$0xff] }
 0x131   : > { %1523 = vmatpush.msrb.mxu0 %v1349_v35  ;;  %1551 = vmatpush.msrb.mxu1 %v1353_v55 }
 0x132   : > { %v1013_v29 = vmul.f32 %v1012_v41, %v1010_v9  ;;  %v1020_v54 = vmul.f32 %v1019_v7, %v1010_v9  ;;  %v1291_v6 = vshll.u32 %v3763_v60, 30  ;;  %v1314_v30 = vsub.s32 4, %v3763_v60 }
 0x133   : > { %1552 = vmatpush.msrb.mxu1 %v1350_v62 }
 0x134   : > { %v1014_v23 = vadd.f32 -0.4999988, %v1013_v29  ;;  %v1021_v53 = vadd.f32 -0.16666654, %v1020_v54  ;;  %v1292_v48 = vsub.s32 %v1288_v56, %v1291_v6 }
 0x136   : > { %v1015_v38 = vmul.f32 %v1014_v23, %v1010_v9  ;;  %v1022_v8 = vmul.f32 %v1021_v53, %v1010_v9  ;;  %vm1293_vm14 = vcmp.lt.s32.totalorder %v1292_v48, 0  ;;  %v1294_v17 = vsub.s32 0, %v1292_v48  ;;  %v1599_v9 = vld [vmem:[%s4309_s8 + $0x48] sm:$0xff]  ;;  %v1596_v23 = vld [vmem:[%s4309_s8 + $0x30] sm:$0xff] }
 0x137   : > { %1634 = vmatpush.msra.mxu2 %v1599_v9  ;;  %v1600_v53 = vld [vmem:[%s4309_s8 + $0x50] sm:$0xff] }
 0x138   : > { %v1016_v24 = vadd.f32 1.0, %v1015_v38  ;;  %v1023_v15 = vadd.f32 1.0, %v1022_v8  ;;  %v1295_v5 = vsel %vm1293_vm14, %v1294_v17, %v1292_v48  ;;  %v1315_v38 = vsel %vm1192_vm4, %v1314_v30, %v3763_v60  ;;  %1663 = vmatpush.msra.mxu3 %v1600_v53  ;;  %v1597_v60 = vld [vmem:[%s4309_s8 + $0x38] sm:$0xff]  ;;  %v1566_v30 = vld [vmem:[%s4310_s9] sm:$0x7] }
 0x139   : > { %v1296_v13 = vclz %v1295_v5  ;;  %1635 = vmatpush.msra.mxu2 %v1596_v23  ;;  %v1346_v5 = vld [vmem:[%s3812_s27 + $0x10] sm:$0xff]  ;;  %v1569_v23 = vperm.slane %v1566_v30, 1 }
 0x13a   : > { %v1024_v37 = vmul.f32 %v1023_v15, %v1008_v59  ;;  %v1032_v1 = vxor.u32 2147483648, %v1016_v24  ;;  %1664 = vmatpush.msra.mxu3 %v1597_v60 }
 0x13b   : > { %v2506_v63 = vadd.s32 4294967294, %v1296_v13  ;;  %v1593_v13 = vld [vmem:[%s4309_s8 + $0x18] sm:$0xff] }
 0x13c   : > { %v1029_v42 = vxor.u32 2147483648, %v1024_v37  ;;  %v1033_v34 = vsel %vm1031_vm0, %v1032_v1, %v1024_v37  ;;  %1636 = vmatpush.msra.mxu2 %v1593_v13 }
 0x13d   : > { %vm2507_vm3 = vcmp.lt.s32.totalorder %v2506_v63, 0 }
 0x13e   : > { %v1030_v32 = vsel %vm1028_vm15, %v1016_v24, %v1029_v42  ;;  %v1299_v18 = vsel %vm2507_vm3, 0, %v2506_v63  ;;  %v1317_v24 = vsel %vm3826_vm6, 0, %v1315_v38 }
 0x13f   : > { %v1034_v45 = vsel %vm1027_vm1, %v1030_v32, %v1033_v34  ;;  %v1300_v28 = vsub.s32 32, %v1299_v18  ;;  %v1304_v14 = vsub.s32 4294967266, %v1299_v18  ;;  %v1301_v61 = vshll.u32 %v1292_v48, %v1299_v18 }
 0x140   : > { %v3772_v49 = vsel %vm1025_vm2, nan, %v1034_v45  ;;  %v1334_v1 = vand.u32 3, %v1317_v24 }
 0x141   : > { %2509 = vmatmul.msk.f32.gmra.mxu0 %vm1366_vm8, %v3772_v49  ;;  %2513 = vmatmul.msk.f32.gmra.mxu1 %vm1366_vm8, %v3772_v49  ;;  %v1302_v19 = vshrl.u32 %v1284_v20, %v1300_v28  ;;  %v1305_v43 = vadd.s32 127, %v1304_v14  ;;  %v1347_v28 = vld [vmem:[%s3812_s27 + $0x18] sm:$0xff]  ;;  %v1590_v14 = vld [vmem:[%s4309_s8] sm:$0xff] }
 0x142   : > { %vm1336_vm7 = vcmp.eq.s32.totalorder %v1334_v1, 0  ;;  %vm1339_vm10 = vcmp.eq.s32.totalorder %v1334_v1, 2  ;;  %vm1335_vm12 = vcmp.lt.s32.totalorder %v1334_v1, 2  ;;  %1637 = vmatpush.msra.mxu2 %v1590_v14 }
 0x143   : > { %v1303_v57 = vor.u32 %v1302_v19, %v1301_v61  ;;  %v1306_v16 = vshll.u32 %v1305_v43, 23  ;;  %v1594_v61 = vld [vmem:[%s4309_s8 + $0x20] sm:$0xff]  ;;  %v1601_v19 = vld [vmem:[%s4309_s8 + $0x58] sm:$0xff] }
 0x144   : > { %1665 = vmatpush.msra.mxu3 %v1594_v61  ;;  %1692 = vmatpush.msra.mxu0 %v1601_v19  ;;  %v1598_v43 = vld [vmem:[%s4309_s8 + $0x40] sm:$0xff] }
 0x145   : > { %v1307_v33 = vor.u32 4788187, %v1306_v16  ;;  %v1310_v51 = vcvt.s32.f32 %v1303_v57  ;;  %v1906_v57 = vld [vmem:[#allocation6 + $0x8] sm:$0xff]  ;;  %v1901_v16 = vld [vmem:[%s672_s19] sm:$0xff] }
 0x146   : > { %1693 = vmatpush.msra.mxu0 %v1598_v43  ;;  %1933 = vmatpush.msra.mxu1 %v1906_v57 }
 0x147   : > { %v1308_v21 = vand.u32 2147483647, %v1307_v33  ;;  %v1903_v33 = vld [vmem:[%s672_s19 + $0x10] sm:$0xff] }
 0x149   : > { %v1311_v39 = vmul.f32 %v1310_v51, %v1308_v21  ;;  %2524 = vmatmul.msk.f32.vlgmr.msrb.gmra.mxu0 %vm1466_vm5, %v3816_v22  ;;  %2528 = vmatmul.msk.f32.vlgmr.msrb.gmra.mxu1 %vm1466_vm5, %v3816_v22 }
 0x14b   : > { %v1312_v59 = vxor.u32 2147483648, %v1311_v39 }
 0x14d   : > { %v1313_v47 = vsel %vm1192_vm4, %v1312_v59, %v1311_v39 }
 0x14e   : > { %v1316_v56 = vsel %vm3826_vm6, %v3328_v31, %v1313_v47  ;;  %v1591_v31 = vld [vmem:[%s4309_s8 + $0x8] sm:$0xff] }
 0x14f   : > { %v1318_v46 = vmul.f32 %v1316_v56, %v1316_v56  ;;  %1666 = vmatpush.msra.mxu3 %v1591_v31 }
 0x151   : > { %v1319_v41 = vmul.f32 -0.001358992, %v1318_v46  ;;  %v1326_v7 = vmul.f32 -0.00019511016, %v1318_v46  ;;  %2525 = vmatmul.msk.f32.gmra.mxu0 %vm1466_vm5, %v1345_v58  ;;  %2529 = vmatmul.msk.f32.gmra.mxu1 %vm1466_vm5, %v1345_v58 }
 0x153   : > { %v1320_v29 = vadd.f32 0.041655596, %v1319_v41  ;;  %v1327_v54 = vadd.f32 0.008332121, %v1326_v7 }
 0x155   : > { %v1321_v6 = vmul.f32 %v1320_v29, %v1318_v46  ;;  %v1328_v2 = vmul.f32 %v1327_v54, %v1318_v46  ;;  %v1602_v29 = vld [vmem:[%s4311_s10] sm:$0x7] }
 0x156   : > { %v3970_v38 = vperm.slane %v1602_v29, 1 }
 0x157   : > { %v1322_v8 = vadd.f32 -0.4999988, %v1321_v6  ;;  %v1329_v48 = vadd.f32 -0.16666654, %v1328_v2  ;;  %v3966_v6 = vperm.slane %v1566_v30, 0  ;;  %v3968_v2 = vperm.slane %v1602_v29, 0 }
 0x159   : > { %v1323_v15 = vmul.f32 %v1322_v8, %v1318_v46  ;;  %v1330_v17 = vmul.f32 %v1329_v48, %v1318_v46  ;;  %2526 = vmatmul.msk.f32.gmra.mxu0 %vm1466_vm5, %v1346_v5  ;;  %2530 = vmatmul.msk.f32.gmra.mxu1 %vm1466_vm5, %v1346_v5 }
 0x15b   : > { %v1324_v44 = vadd.f32 1.0, %v1323_v15  ;;  %v1331_v37 = vadd.f32 1.0, %v1330_v17 }
 0x15d   : > { %v1332_v42 = vmul.f32 %v1331_v37, %v1316_v56  ;;  %v1340_v63 = vxor.u32 2147483648, %v1324_v44 }
 0x15f   : > { %v1337_v32 = vxor.u32 2147483648, %v1332_v42  ;;  %v1341_v45 = vsel %vm1339_vm10, %v1340_v63, %v1332_v42 }
 0x161   : > { %v1338_v34 = vsel %vm1336_vm7, %v1324_v44, %v1337_v32  ;;  %2527 = vmatmul.msk.f32.gmra.mxu0 %vm1466_vm5, %v1347_v28  ;;  %2531 = vmatmul.msk.f32.gmra.mxu1 %vm1466_vm5, %v1347_v28 }
 0x162   : > { %v1342_v18 = vsel %vm1335_vm12, %v1338_v34, %v1341_v45 }
 0x163   : > { %v1343_v20 = vsel %vm1333_vm9, nan, %v1342_v18 }
 0x164   : > { %2511 = vmatmul.msk.f32.gmra.mxu2 %vm1366_vm8, %v1343_v20  ;;  %2515 = vmatmul.msk.f32.gmra.mxu3 %vm1366_vm8, %v1343_v20 }
 0x16c   : > { %2516 = vmatmul.msk.f32.vlgmr.msrb.gmra.mxu2 %vm1366_vm8, %v3645_v11  ;;  %2520 = vmatmul.msk.f32.vlgmr.msrb.gmra.mxu3 %vm1466_vm5, %v3816_v22  ;;  %v1595_v11 = vld [vmem:[%s4309_s8 + $0x28] sm:$0xff] }
 0x16d   : > { %1694 = vmatpush.msra.mxu0 %v1595_v11 }
 0x174   : > { %2517 = vmatmul.msk.f32.gmra.mxu2 %vm1366_vm8, %v3772_v49  ;;  %2521 = vmatmul.msk.f32.gmra.mxu3 %vm1466_vm5, %v1345_v58  ;;  %v1905_v49 = vld [vmem:[#allocation6] sm:$0xff] }
 0x175   : > { %1934 = vmatpush.msra.mxu1 %v1905_v49 }
 0x176   : > { %2552 = vmatmul.msk.f32.vlgmr.msra.gmra.mxu1 %vm1366_vm8, %v1901_v16 }
 0x17c   : > { %2518 = vmatmul.msk.f32.gmra.mxu2 %vm1366_vm8, %v3725_v27  ;;  %2522 = vmatmul.msk.f32.gmra.mxu3 %vm1466_vm5, %v1346_v5  ;;  %v1592_v27 = vld [vmem:[%s4309_s8 + $0x10] sm:$0xff] }
 0x17d   : > { %1695 = vmatpush.msra.mxu0 %v1592_v27 }
 0x17e   : > { %2540 = vmatmul.msk.f32.vlgmr.msra.gmra.mxu0 %vm1466_vm5, %v3916_v36  ;;  %2553 = vmatmul.msk.f32.gmra.mxu1 %vm1366_vm8, %v1902_v3 }
 0x183   : > { %v1396_v12 = vpop.f32.mrf.mxu0  ;;  %v1425_v22 = vpop.f32.mrf.mxu1 }
 0x184   : > { %2519 = vmatmul.msk.f32.gmra.mxu2 %vm1366_vm8, %v1343_v20  ;;  %2523 = vmatmul.msk.f32.gmra.mxu3 %vm1466_vm5, %v1347_v28 }
 0x186   : > { %2541 = vmatmul.msk.f32.gmra.mxu0 %vm1466_vm5, %v3925_v26  ;;  %2554 = vmatmul.msk.f32.gmra.mxu1 %vm1366_vm8, %v1903_v33 }
 0x18c   : > { %2532 = vmatmul.msk.f32.vlgmr.msra.gmra.mxu2 %vm1466_vm5, %v3916_v36  ;;  %2536 = vmatmul.msk.f32.vlgmr.msra.gmra.mxu3 %vm1466_vm5, %v3916_v36 }
 0x18e   : > { %2542 = vmatmul.msk.f32.gmra.mxu0 %vm1466_vm5, %v3934_v40  ;;  %2555 = vmatmul.msk.f32.gmra.mxu1 %vm1366_vm8, %v1904_v25 }
 0x194   : > { %2533 = vmatmul.msk.f32.gmra.mxu2 %vm1466_vm5, %v3925_v26  ;;  %2537 = vmatmul.msk.f32.gmra.mxu3 %vm1466_vm5, %v3925_v26 }
 0x196   : > { %2543 = vmatmul.msk.f32.gmra.mxu0 %vm1466_vm5, %v3943_v50 }
 0x19c   : > { %2534 = vmatmul.msk.f32.gmra.mxu2 %vm1466_vm5, %v3934_v40  ;;  %2538 = vmatmul.msk.f32.gmra.mxu3 %vm1466_vm5, %v3934_v40 }
 0x1a0   : > { %v1402_v21 = vpop.f32.mrf.mxu2  ;;  %v1431_v51 = vpop.f32.mrf.mxu3 }
 0x1a4   : > { %2535 = vmatmul.msk.f32.gmra.mxu2 %vm1466_vm5, %v3943_v50  ;;  %2539 = vmatmul.msk.f32.gmra.mxu3 %vm1466_vm5, %v3943_v50 }
 0x1be   : > { %v1399_v39 = vpop.f32.mrf.mxu0  ;;  %v1428_v47 = vpop.f32.mrf.mxu1 }
 0x1c6   : > { %v1525_v9 = vpop.f32.mrf.mxu0  ;;  %v1554_v62 = vpop.f32.mrf.mxu1 }
 0x1c7   : > { %v1526_v58 = vadd.f32 %v1525_v9, %v1425_v22 }
 0x1c9   : > { %v1575_v15 = vadd.f32 %v1569_v23, %v1526_v58 }
 0x1ce   : > { %v1528_v46 = vpop.f32.mrf.mxu0  ;;  %v1557_v8 = vpop.f32.mrf.mxu1 }
 0x1cf   : > { %v1529_v13 = vadd.f32 %v1528_v46, %v1428_v47 }
 0x1d1   : > { %v1578_v18 = vadd.f32 %v1569_v23, %v1529_v13 }
 0x1d6   : > { %v1531_v54 = vpop.f32.mrf.mxu0  ;;  %v1560_v61 = vpop.f32.mrf.mxu1 }
 0x1d7   : > { %v1532_v43 = vadd.f32 %v1531_v54, %v1431_v51 }
 0x1de   : > { %v1534_v42 = vpop.f32.mrf.mxu0  ;;  %v1563_v58 = vpop.f32.mrf.mxu1 }
 0x1e7   : > { %v3952_v0 = vpop.f32.mrf.mxu2  ;;  %v1434_v10 = vpop.f32.mrf.mxu3 }
 0x1ef   : > { %v3954_v35 = vpop.f32.mrf.mxu2  ;;  %v1496_v59 = vpop.f32.mrf.mxu3 }
 0x1f0   : > { %v1497_v53 = vadd.f32 %v1496_v59, %v1396_v12  ;;  %v3982_v12 = vperm.slane %v1566_v30, 2  ;;  %v1535_v59 = vadd.f32 %v1534_v42, %v1434_v10  ;;  %v1555_v47 = vadd.f32 %v1554_v62, %v3954_v35 }
 0x1f2   : > { %v1574_v17 = vadd.f32 %v3966_v6, %v1497_v53  ;;  %v3992_v53 = vperm.slane %v1602_v29, 2 }
 0x1f7   : > { %v3956_v4 = vpop.f32.mrf.mxu2  ;;  %v1499_v52 = vpop.f32.mrf.mxu3 }
 0x1f8   : > { %v1500_v60 = vadd.f32 %v1499_v52, %v1399_v39  ;;  %v1581_v39 = vadd.f32 %v1569_v23, %v1532_v43 }
 0x1fa   : > { %v1577_v20 = vadd.f32 %v3966_v6, %v1500_v60 }
 0x1fb   : > { %v1697_v49 = vpop.f32.mrf.mxu0 }
 0x1fc   : > { %v1698_v13 = vadd.f32 %v1697_v49, %v3992_v53 }
 0x1ff   : > { %v1460_v55 = vpop.f32.mrf.mxu2  ;;  %v1502_v56 = vpop.f32.mrf.mxu3 }
 0x200   : > { %v1503_v57 = vadd.f32 %v1502_v56, %v1402_v21  ;;  %v1558_v56 = vadd.f32 %v1557_v8, %v3956_v4  ;;  %v1561_v46 = vadd.f32 %v1560_v61, %v1460_v55 }
 0x202   : > { %v1580_v51 = vadd.f32 %v3966_v6, %v1503_v57  ;;  %v3998_v35 = vadd.f32 %v3982_v12, %v1558_v56  ;;  %v4001_v4 = vadd.f32 %v3982_v12, %v1561_v46 }
 0x207   : > { %v3958_v41 = vpop.f32.mrf.mxu2  ;;  %v1505_v7 = vpop.f32.mrf.mxu3 }
 0x208   : > { %v1506_v10 = vadd.f32 %v1505_v7, %v3952_v0  ;;  %v4009_v7 = vadd.f32 %v1563_v58, %v3958_v41 }
 0x20a   : > { %v1583_v62 = vadd.f32 %v3966_v6, %v1506_v10 }
 0x20f   : > { %v1639_v48 = vpop.f32.mrf.mxu2  ;;  %v1668_v24 = vpop.f32.mrf.mxu3 }
 0x210   : > { %v1640_v44 = vadd.f32 %v1639_v48, %v3968_v2  ;;  %v1669_v37 = vadd.f32 %v1668_v24, %v3970_v38  ;;  %v1584_v24 = vadd.f32 %v1569_v23, %v1535_v59  ;;  %v1700_v23 = vpop.f32.mrf.mxu0 }
 0x211   : > { %v1701_v49 = vadd.f32 %v1700_v23, %v3992_v53 }
 0x212   : > { %v1709_v1 = vadd.f32 %v1640_v44, %v1574_v17  ;;  %v1789_v5 = vadd.f32 %v1669_v37, %v1575_v15  ;;  %v3995_v37 = vadd.f32 %v3982_v12, %v1555_v47 }
 0x214   : > { %v2544_v63 = vmul.f32 -1.442695, %v1709_v1  ;;  %v2548_v32 = vmul.f32 -1.442695, %v1789_v5 }
 0x216   : > { %2805 = vpow2.f32 %v2544_v63 }
 0x217   : > { %2807 = vpow2.f32 %v2548_v32  ;;  %v1642_v34 = vpop.f32.mrf.mxu2  ;;  %v1671_v45 = vpop.f32.mrf.mxu3 }
 0x218   : > { %v1643_v28 = vadd.f32 %v1642_v34, %v3968_v2  ;;  %v1672_v14 = vadd.f32 %v1671_v45, %v3970_v38  ;;  %v1703_v46 = vpop.f32.mrf.mxu0 }
 0x21a   : > { %v1710_v31 = vadd.f32 %v1643_v28, %v1577_v20  ;;  %v1790_v19 = vadd.f32 %v1672_v14, %v1578_v18 }
 0x21c   : > { %v2806_v11 = vpop.eup %2805  ;;  %v2545_v27 = vmul.f32 -1.442695, %v1710_v31  ;;  %v2549_v33 = vmul.f32 -1.442695, %v1790_v19 }
 0x21d   : > { %v2808_v16 = vpop.eup %2807  ;;  %v3978_v3 = vadd.f32 1.0, %v2806_v11 }
 0x21e   : > { %v3980_v25 = vadd.f32 1.0, %v2808_v16  ;;  %2809 = vpow2.f32 %v2545_v27 }
 0x21f   : > { %2811 = vrcp.f32 %v3978_v3  ;;  %v1645_v22 = vpop.f32.mrf.mxu2  ;;  %v1674_v9 = vpop.f32.mrf.mxu3  ;;  %v1738_v60 = vand.u32 2147483647, %v3978_v3  ;;  %v1740_v42 = vand.u32 2147483648, %v3978_v3  ;;  %vm1734_vm8 = vweird.f32 %v3978_v3 }
 0x220   : > { %2813 = vrcp.f32 %v3980_v25  ;;  %v1646_v21 = vadd.f32 %v1645_v22, %v3968_v2  ;;  %v1675_v52 = vadd.f32 %v1674_v9, %v3970_v38  ;;  %v1818_v45 = vand.u32 2147483647, %v3980_v25 }
 0x221   : > { %2815 = vpow2.f32 %v2549_v33  ;;  %v1820_v28 = vand.u32 2147483648, %v3980_v25  ;;  %vm1814_vm11 = vweird.f32 %v3980_v25  ;;  %vm4027_vm14 = vcmp.eq.f32.partialorder %v1738_v60, 8.507059e+37 }
 0x222   : > { %v1711_v30 = vadd.f32 %v1646_v21, %v1580_v51  ;;  %v1791_v54 = vadd.f32 %v1675_v52, %v1581_v39  ;;  %v1741_v43 = vor.u32 1.1754944e-38, %v1740_v42  ;;  %vm4040_vm0 = vcmp.eq.f32.partialorder %v1818_v45, 8.507059e+37 }
 0x223   : > { %v1821_v9 = vor.u32 1.1754944e-38, %v1820_v28 }
 0x224   : > { %v2810_v48 = vpop.eup %2809  ;;  %v2546_v15 = vmul.f32 -1.442695, %v1711_v30  ;;  %v2550_v17 = vmul.f32 -1.442695, %v1791_v54 }
 0x225   : > { %v2812_v44 = vpop.eup %2811  ;;  %v4003_v0 = vadd.f32 1.0, %v2810_v48 }
 0x226   : > { %v4005_v55 = vpop.eup %2813  ;;  %2817 = vpow2.f32 %v2546_v15  ;;  %v1730_v29 = vmul.f32 %v2812_v44, %v3978_v3  ;;  %vm1735_vm13 = vweird.f32 %v2812_v44 }
 0x227   : > { %v2816_v8 = vpop.eup %2815  ;;  %2819 = vrcp.f32 %v4003_v0  ;;  %v1648_v1 = vpop.f32.mrf.mxu2  ;;  %v1810_v34 = vmul.f32 %v4005_v55, %v3980_v25  ;;  %vm1736_vm15 = vmor %vm1734_vm8, %vm1735_vm13  ;;  %v1753_v59 = vand.u32 2147483647, %v4003_v0  ;;  %v1755_v52 = vand.u32 2147483648, %v4003_v0 }
 0x228   : > { %v1677_v5 = vpop.f32.mrf.mxu3  ;;  %v4016_v63 = vadd.f32 1.0, %v2816_v8  ;;  %2821 = vpow2.f32 %v2550_v17  ;;  %v1649_v41 = vadd.f32 %v1648_v1, %v3968_v2  ;;  %v1731_v32 = vsub.f32 1.0, %v1730_v29 }
 0x229   : > { %v1678_v6 = vadd.f32 %v1677_v5, %v3970_v38  ;;  %v1811_v61 = vsub.f32 1.0, %v1810_v34  ;;  %vm1815_vm1 = vweird.f32 %v4005_v55  ;;  %vm1749_vm2 = vweird.f32 %v4003_v0 }
 0x22a   : > { %2823 = vrcp.f32 %v4016_v63  ;;  %v1712_v18 = vadd.f32 %v1649_v41, %v1583_v62  ;;  %v1732_v14 = vmul.f32 %v2812_v44, %v1731_v32  ;;  %vm4056_vm4 = vcmp.eq.f32.partialorder %v1753_v59, 8.507059e+37  ;;  %vm4068_vm6 = vmor %vm1814_vm11, %vm1815_vm1  ;;  %v1936_v41 = vpop.f32.mrf.mxu1 }
 0x22b   : > { %v1792_v20 = vadd.f32 %v1678_v6, %v1584_v24  ;;  %v1812_v16 = vmul.f32 %v4005_v55, %v1811_v61  ;;  %v1756_v15 = vor.u32 1.1754944e-38, %v1755_v52  ;;  %v4064_v17 = vadd.f32 %v1703_v46, %v3992_v53 }
 0x22c   : > { %v2818_v2 = vpop.eup %2817  ;;  %v2547_v38 = vmul.f32 -1.442695, %v1712_v18  ;;  %v1733_v27 = vadd.f32 %v2812_v44, %v1732_v14  ;;  %vm1829_vm7 = vweird.f32 %v4016_v63 }
 0x22d   : > { %v2551_v31 = vmul.f32 -1.442695, %v1792_v20  ;;  %v2820_v11 = vpop.eup %2819  ;;  %v4031_v57 = vadd.f32 1.0, %v2818_v2  ;;  %v1813_v30 = vadd.f32 %v4005_v55, %v1812_v16 }
 0x22e   : > { %v2822_v33 = vpop.eup %2821  ;;  %2825 = vpow2.f32 %v2547_v38  ;;  %v1745_v39 = vmul.f32 %v2820_v11, %v4003_v0  ;;  %v1737_v21 = vsel %vm1736_vm15, %v2812_v44, %v1733_v27  ;;  %vm1750_vm3 = vweird.f32 %v2820_v11 }
 0x22f   : > { %2827 = vrcp.f32 %v4031_v57  ;;  %v4045_v51 = vadd.f32 1.0, %v2822_v33  ;;  %v1742_v3 = vsel %vm4027_vm14, %v1741_v43, %v1737_v21  ;;  %v1817_v23 = vsel %vm4068_vm6, %v4005_v55, %v1813_v30  ;;  %vm1751_vm10 = vmor %vm1749_vm2, %vm1750_vm3 }
 0x230   : > { %v4048_v47 = vpop.eup %2823  ;;  %2829 = vpow2.f32 %v2551_v31  ;;  %v1746_v56 = vsub.f32 1.0, %v1745_v39  ;;  %v1869_v10 = vmul.f32 %v1742_v3, %v1698_v13  ;;  %v1768_v25 = vand.u32 2147483647, %v4031_v57 }
 0x231   : > { %2831 = vrcp.f32 %v4045_v51  ;;  %v1825_v48 = vmul.f32 %v4048_v47, %v4016_v63  ;;  %v1835_v13 = vand.u32 2147483648, %v4016_v63  ;;  %vm1830_vm12 = vweird.f32 %v4048_v47 }
 0x232   : > { %v1747_v54 = vmul.f32 %v2820_v11, %v1746_v56  ;;  %v1873_v24 = vadd.f32 %v1869_v10, %v3995_v37  ;;  %v1833_v37 = vand.u32 2147483647, %v4016_v63  ;;  %v1822_v45 = vsel %vm4040_vm0, %v1821_v9, %v1817_v23  ;;  %vm4114_vm11 = vmor %vm1829_vm7, %vm1830_vm12  ;;  %v4131_v56 = vld [vmem:[#allocation7] ss:$0 sm:$0xff]  ;;  %v1939_v44 = vpop.f32.mrf.mxu1 }
 0x233   : > { %v1826_v8 = vsub.f32 1.0, %v1825_v48  ;;  %vm1764_vm9 = vweird.f32 %v4031_v57  ;;  %v1770_v14 = vand.u32 2147483648, %v4031_v57  ;;  %v1881_v19 = vsub.f32 1.0, %v1822_v45 }
 0x234   : > { %v2826_v62 = vpop.eup %2825  ;;  %v1748_v29 = vadd.f32 %v2820_v11, %v1747_v54  ;;  %2833 = vtanh.f32 %v1873_v24  ;;  %vm4098_vm8 = vcmp.eq.f32.partialorder %v1833_v37, 8.507059e+37  ;;  %vm4118_vm14 = vcmp.eq.f32.partialorder %v1768_v25, 8.507059e+37  ;;  %v1706_v24 = vpop.f32.mrf.mxu0 }
 0x235   : > { %v2828_v1 = vpop.eup %2827  ;;  %v4077_v5 = vadd.f32 1.0, %v2826_v62  ;;  %v1827_v6 = vmul.f32 %v4048_v47, %v1826_v8  ;;  %v1889_v63 = vmul.f32 %v1822_v45, %v3916_v36  ;;  %v1771_v22 = vor.u32 1.1754944e-38, %v1770_v14 }
 0x236   : > { %v2830_v60 = vpop.eup %2829  ;;  %v1752_v42 = vsel %vm1751_vm10, %v2820_v11, %v1748_v29  ;;  %v1760_v55 = vmul.f32 %v2828_v1, %v4031_v57  ;;  %vm1765_vm13 = vweird.f32 %v2828_v1  ;;  %v1850_v54 = vand.u32 2147483648, %v4045_v51 }
 0x237   : > { %v4087_v32 = vpop.eup %2831  ;;  %2835 = vrcp.f32 %v4077_v5  ;;  %v4090_v34 = vadd.f32 1.0, %v2830_v60  ;;  %v1757_v0 = vsel %vm4056_vm4, %v1756_v15, %v1752_v42  ;;  %v1828_v61 = vadd.f32 %v4048_v47, %v1827_v6  ;;  %vm1766_vm15 = vmor %vm1764_vm9, %vm1765_vm13 }
 0x238   : > { %v1870_v18 = vmul.f32 %v1757_v0, %v1701_v49  ;;  %v1761_v20 = vsub.f32 1.0, %v1760_v55  ;;  %v1840_v2 = vmul.f32 %v4087_v32, %v4045_v51  ;;  %v1836_v49 = vor.u32 1.1754944e-38, %v1835_v13 }
 0x239   : > { %2837 = vrcp.f32 %v4090_v34  ;;  %v1783_v9 = vand.u32 2147483647, %v4077_v5  ;;  %v1785_v21 = vand.u32 2147483648, %v4077_v5  ;;  %vm1845_vm0 = vweird.f32 %v4087_v32 }
 0x23a   : > { %v1874_v38 = vadd.f32 %v1870_v18, %v3998_v35  ;;  %v1762_v31 = vmul.f32 %v2828_v1, %v1761_v20  ;;  %v2834_v11 = vpop.eup %2833  ;;  %v1832_v35 = vsel %vm4114_vm11, %v4048_v47, %v1828_v61  ;;  %v1841_v16 = vsub.f32 1.0, %v1840_v2  ;;  %v1942_v43 = vpop.f32.mrf.mxu1 }
 0x23b   : > { %v1885_v39 = vmul.f32 %v2834_v11, %v1881_v19  ;;  %v1837_v36 = vsel %vm4098_vm8, %v1836_v49, %v1832_v35  ;;  %vm1844_vm2 = vweird.f32 %v4045_v51  ;;  %v1848_v23 = vand.u32 2147483647, %v4045_v51 }
 0x23c   : > { %2839 = vtanh.f32 %v1874_v38  ;;  %v1763_v33 = vadd.f32 %v2828_v1, %v1762_v31  ;;  %v1842_v52 = vmul.f32 %v4087_v32, %v1841_v16  ;;  %v1882_v29 = vsub.f32 1.0, %v1837_v36  ;;  %vm4157_vm3 = vmor %vm1844_vm2, %vm1845_vm0 }
 0x23d   : > { %v2836_v59 = vpop.eup %2835  ;;  %v1893_v3 = vadd.f32 %v1889_v63, %v1885_v39  ;;  %v1707_v60 = vadd.f32 %v1706_v24, %v3992_v53  ;;  %v1890_v55 = vmul.f32 %v1837_v36, %v3925_v26  ;;  %vm1779_vm4 = vweird.f32 %v4077_v5 }
 0x23e   : > { %v1767_v47 = vsel %vm1766_vm15, %v2828_v1, %v1763_v33  ;;  %v1775_v46 = vmul.f32 %v2836_v59, %v4077_v5  ;;  %v1843_v30 = vadd.f32 %v4087_v32, %v1842_v52  ;;  %vm1780_vm1 = vweird.f32 %v2836_v59 }
 0x23f   : > { %v4136_v10 = vpop.eup %2837  ;;  %v1772_v57 = vsel %vm4118_vm14, %v1771_v22, %v1767_v47  ;;  %1897 = vst.msk [vmem:[%s4145_s30] sm:$0xff] %vm1466_vm5, %v1893_v3  ;;  %v1948_v48 = vadd.f32 %v1936_v41, %v1893_v3  ;;  %v1851_v41 = vor.u32 1.1754944e-38, %v1850_v54  ;;  %vm1781_vm6 = vmor %vm1779_vm4, %vm1780_vm1  ;;  %v1786_v53 = vor.u32 1.1754944e-38, %v1785_v21 }
 0x240   : > { %v1871_v58 = vmul.f32 %v1772_v57, %v4064_v17  ;;  %v1776_v15 = vsub.f32 1.0, %v1775_v46  ;;  %v1855_v62 = vmul.f32 %v4136_v10, %v4090_v34  ;;  %v1847_v51 = vsel %vm4157_vm3, %v4087_v32, %v1843_v30 }
 0x241   : > { %v1956_v37 = vadd.f32 %v4131_v56, %v1948_v48  ;;  %vm1849_vm7 = vcmp.eq.f32.partialorder %v1848_v23, 8.507059e+37  ;;  %vm1784_vm10 = vcmp.eq.f32.partialorder %v1783_v9, 8.507059e+37  ;;  %vm1860_vm12 = vweird.f32 %v4136_v10 }
 0x242   : > { %v2840_v17 = vpop.eup %2839  ;;  %v1875_v8 = vadd.f32 %v1871_v58, %v4001_v4  ;;  %v1777_v1 = vmul.f32 %v2836_v59, %v1776_v15  ;;  %v1856_v13 = vsub.f32 1.0, %v1855_v62  ;;  %v1852_v32 = vsel %vm1849_vm7, %v1851_v41, %v1847_v51 }
 0x243   : > { %v1886_v42 = vmul.f32 %v2840_v17, %v1882_v29  ;;  %1960 = vst.msk [vmem:[%s4167_s17] sm:$0xff] %vm1466_vm5, %v1956_v37  ;;  %v1585_v5 = vadd.f32 %v3982_v12, %v4009_v7  ;;  %v1865_v14 = vand.u32 2147483648, %v4090_v34  ;;  %v1883_v2 = vsub.f32 1.0, %v1852_v32 }
 0x244   : > { %2841 = vtanh.f32 %v1875_v8  ;;  %v1778_v4 = vadd.f32 %v2836_v59, %v1777_v1  ;;  %v1857_v26 = vmul.f32 %v4136_v10, %v1856_v13  ;;  %vm1859_vm9 = vweird.f32 %v4090_v34 }
 0x245   : > { %v1894_v6 = vadd.f32 %v1890_v55, %v1886_v42  ;;  %v1863_v38 = vand.u32 2147483647, %v4090_v34  ;;  %vm1861_vm8 = vmor %vm1859_vm9, %vm1860_vm12  ;;  %v1891_v12 = vmul.f32 %v1852_v32, %v3934_v40  ;;  %v1866_v27 = vor.u32 1.1754944e-38, %v1865_v14 }
 0x246   : > { %v1782_v0 = vsel %vm1781_vm6, %v2836_v59, %v1778_v4  ;;  %v1858_v20 = vadd.f32 %v4136_v10, %v1857_v26  ;;  %v1945_v59 = vpop.f32.mrf.mxu1 }
 0x247   : > { %v1787_v45 = vsel %vm1784_vm10, %v1786_v53, %v1782_v0  ;;  %1898 = vst.msk [vmem:[%s4145_s30 + $0x8] sm:$0xff] %vm1466_vm5, %v1894_v6  ;;  %v1949_v18 = vadd.f32 %v1939_v44, %v1894_v6  ;;  %vm1864_vm13 = vcmp.eq.f32.partialorder %v1863_v38, 8.507059e+37 }
 0x248   : > { %v1872_v28 = vmul.f32 %v1787_v45, %v1707_v60  ;;  %v1862_v7 = vsel %vm1861_vm8, %v4136_v10, %v1858_v20 }
 0x249   : > { %v1957_v61 = vadd.f32 %v4131_v56, %v1949_v18  ;;  %v1867_v49 = vsel %vm1864_vm13, %v1866_v27, %v1862_v7 }
 0x24a   : > { %v2842_v31 = vpop.eup %2841  ;;  %v1876_v19 = vadd.f32 %v1872_v28, %v1585_v5  ;;  %v1884_v33 = vsub.f32 1.0, %v1867_v49  ;;  %v1892_v40 = vmul.f32 %v1867_v49, %v3943_v50 }
 0x24b   : > { %1961 = vst.msk [vmem:[%s4167_s17 + $0x8] sm:$0xff] %vm1466_vm5, %v1957_v61  ;;  %v1887_v11 = vmul.f32 %v2842_v31, %v1883_v2 }
 0x24c   : > { %2843 = vtanh.f32 %v1876_v19 }
 0x24d   : > { %v1895_v35 = vadd.f32 %v1891_v12, %v1887_v11 }
 0x24f   : > { %1899 = vst.msk [vmem:[%s4145_s30 + $0x10] sm:$0xff] %vm1466_vm5, %v1895_v35  ;;  %v1950_v34 = vadd.f32 %v1942_v43, %v1895_v35 }
 0x251   : > { %v1958_v16 = vadd.f32 %v4131_v56, %v1950_v34 }
 0x252   : > { %v2844_v39 = vpop.eup %2843 }
 0x253   : > { %1962 = vst.msk [vmem:[%s4167_s17 + $0x10] sm:$0xff] %vm1466_vm5, %v1958_v16  ;;  %v1888_v63 = vmul.f32 %v2844_v39, %v1884_v33 }
 0x255   : > { %v1896_v22 = vadd.f32 %v1892_v40, %v1888_v63 }
 0x257   : > { %1900 = vst.msk [vmem:[%s4145_s30 + $0x18] sm:$0xff] %vm1466_vm5, %v1896_v22  ;;  %v1951_v9 = vadd.f32 %v1945_v59, %v1896_v22  ;;  %1974 = sbr.rel (!%p3242_p4) target bundleno = 643 (0x283), region = 92 }
 0x259   : > { %v1959_v21 = vadd.f32 %v4131_v56, %v1951_v9 }
 0x25b   : > { %1963 = vst.msk [vmem:[%s4167_s17 + $0x18] sm:$0xff] %vm1466_vm5, %v1959_v21 }
 0x25c   : > { %s4367_s22 = smov (!%p1977_p11, %s1976_s22), 4 }
 0x25d   : > { %s2559_s28 = sshll.u32 %s4367_s22, 3 }
 0x25e   : > { %p2562_p12 = scmp.eq.s32.totalorder %s2559_s28, 0 }
 0x25f   : > { %s4212_s18 = sshrl.u32 (!%p2562_p12), %s4367_s22, 2 }
 0x260   : > { %1985 = sbr.rel (%p2562_p12) target bundleno = 643 (0x283), region = 96  ;;  %p2563_p13 = scmp.le.s32.totalorder (!%p2562_p12), %s4212_s18, 0 }
 0x265   : > { %2339 = sbr.rel (%p2563_p13) target bundleno = 626 (0x272), region = 254  ;;  %s4356_s20 = smov (!%p2563_p13), %s4206_s26 }
 0x266   : > { %s4357_s13 = smov (!%p2563_p13), %s4145_s30  ;;  %s4221_s23 = smov (!%p2563_p13), 0  }
 0x267   : > { %s3077_s27 = smov (!%p2563_p13), 0  }
 0x26a LB: >> { %v2054_v50 = vld [vmem:[%s3071_s13] sm:$0xff]  ;;  %v2056_v52 = vld [vmem:[%s3071_s13 + $0x8] sm:$0xff]  ;;  %v2058_v47 = vld [vmem:[%s3071_s13 + $0x10] sm:$0xff]  ;;  %s2062_s5 = sadd.s32 1, %s3075_s23  ;;  %s2048_s27 = sadd.s32 1, %s3079_s27   ;;  %s3079_s27 = sphi %s3077_s27, %s2048_s27   ;;  %s3075_s23 = sphi %s4221_s23, %s4358_s23   ;;  %s3071_s13 = sphi %s4357_s13, %s2067_s13   ;;  %s3067_s20 = sphi %s4356_s20, %s2068_s20  }
 0x26b   : >> { %2055 = vst [vmem:[%s3067_s20] sm:$0xff] %v2054_v50  ;;  %v2060_v3 = vld [vmem:[%s3071_s13 + $0x18] sm:$0xff]  ;;  %p2063_p0 = scmp.ge.s32.totalorder %s2062_s5, %s4212_s18  ;;  %p2047_p1 = scmp.ge.s32.totalorder %s2048_s27, %s4212_s18 }
 0x26c   : >> { %2057 = vst [vmem:[%s3067_s20 + $0x8] sm:$0xff] %v2056_v52 }
 0x26d   : >> { %2059 = vst [vmem:[%s3067_s20 + $0x10] sm:$0xff] %v2058_v47  ;;  %s4369_s5 = smov (%p2063_p0, %s2062_s5), 0  ;;  %2050 = sbr.rel (!%p2047_p1) target bundleno = 618 (0x26a), region = 260 }
 0x26e   : >> { %2061 = vst [vmem:[%s3067_s20 + $0x18] sm:$0xff] %v2060_v3  ;;  %s2564_s14 = sshll.u32 %s4369_s5, 5  ;;  %s4358_s23 = smov %s4369_s5 }
 0x26f   : >> { %s2067_s13 = scalar_lea.vmem %s4145_s30, %s2564_s14 [#allocation9]   ;;  %s2068_s20 = scalar_lea.vmem %s4206_s26, %s2564_s14  }
 0x272 PF: > { %s4237_s29 = sand.u32 3, %s4367_s22   ;;  %s2589_s25 = sshll.u32 %s4212_s18, 5 }
 0x273   : > { %s2073_s15 = scalar_lea.vmem %s4145_s30, %s2589_s25 [#allocation9]   ;;  %s2075_s19 = scalar_lea.vmem %s4206_s26, %s2589_s25  }
 0x274   : > { %p2569_p2 = scmp.le.s32.totalorder %s4237_s29, 0 }
 0x275   : > { %s3081_s24 = smov (!%p2569_p2), %s2075_s19   ;;  %s3085_s28 = smov (!%p2569_p2), %s2073_s15  }
 0x276   : > { %2353 = sbr.rel (%p2569_p2) target bundleno = 643 (0x283), region = 265  ;;  %s3089_s23 = smov (!%p2569_p2), 0  }
 0x277   : > { %s3093_s14 = smov (!%p2569_p2), 0  }
 0x27b LB: >> { %v2085_v56 = vld [vmem:[%s3087_s28] sm:$0xff]  ;;  %s2087_s22 = sadd.s32 1, %s3091_s23  ;;  %s2079_s14 = sadd.s32 1, %s3095_s14   ;;  %s3095_s14 = sphi %s3093_s14, %s2079_s14   ;;  %s3091_s23 = sphi %s3089_s23, %s3090_s23   ;;  %s3087_s28 = sphi %s3085_s28, %s2092_s28   ;;  %s3083_s24 = sphi %s3081_s24, %s2093_s24  }
 0x27c   : >> { %2086 = vst [vmem:[%s3083_s24] sm:$0xff] %v2085_v56  ;;  %p2088_p3 = scmp.ge.s32.totalorder %s2087_s22, %s4237_s29  ;;  %p2078_p5 = scmp.ge.s32.totalorder %s2079_s14, %s4237_s29 }
 0x27e   : >> { %s4371_s22 = smov (%p2088_p3, %s2087_s22), 0  ;;  %2081 = sbr.rel (!%p2078_p5) target bundleno = 635 (0x27b), region = 271 }
 0x27f   : >> { %s2570_s30 = sshll.u32 %s4371_s22, 3  ;;  %s3090_s23 = smov %s4371_s22  }
 0x280   : >> { %s2092_s28 = scalar_lea.vmem %s2073_s15, %s2570_s30 [#allocation9]   ;;  %s2093_s24 = scalar_lea.vmem %s2075_s19, %s2570_s30  }
 0x283 PF: > { %2099 = sbr.rel (!%p3242_p4) target bundleno = 687 (0x2af), region = 144  ;;  %s2101_s26 = ssub.s32 (%p3242_p4), 7, %s3294_s4 }
 0x284   : > { %s2591_s18 = sshll.u32 (%p3242_p4), %s3230_s16, 5  ;;  %p2102_p6 = scmp.lt.s32.totalorder (%p3242_p4), %s2101_s26, 4 }
 0x285   : > { %s4359_s27 = sld [smem:[#allocation20_spill]] (%p3242_p4) }
 0x288   : > { %s4373_s26 = smov (!%p2102_p6, %s2101_s26), 4 }
 0x289   : > { %s2573_s25 = sshll.u32 %s4373_s26, 3 }
 0x28a   : > { %p2576_p7 = scmp.eq.s32.totalorder %s2573_s25, 0 }
 0x28b   : > { %s4252_s5 = scalar_lea.vmem %s4359_s27, %s2591_s18   ;;  %s4258_s29 = sshrl.u32 (!%p2576_p7), %s4373_s26, 2 }
 0x28c   : > { %2110 = sbr.rel (%p2576_p7) target bundleno = 687 (0x2af), region = 148  ;;  %p2577_p4 = scmp.le.s32.totalorder (!%p2576_p7), %s4258_s29, 0 }
 0x291   : > { %2367 = sbr.rel (%p2577_p4) target bundleno = 670 (0x29e), region = 276  ;;  %s4360_s16 = smov (!%p2577_p4), %s4252_s5 }
 0x292   : > { %s4361_s21 = smov (!%p2577_p4), %s4167_s17  ;;  %s4267_s4 = smov (!%p2577_p4), 0  }
 0x293   : > { %s3109_s15 = smov (!%p2577_p4), 0  }
 0x296 LB: >> { %v2179_v46 = vld [vmem:[%s3103_s21] sm:$0xff]  ;;  %v2181_v36 = vld [vmem:[%s3103_s21 + $0x8] sm:$0xff]  ;;  %v2183_v10 = vld [vmem:[%s3103_s21 + $0x10] sm:$0xff]  ;;  %s2187_s19 = sadd.s32 1, %s3107_s4  ;;  %s2173_s15 = sadd.s32 1, %s3111_s15   ;;  %s3111_s15 = sphi %s3109_s15, %s2173_s15   ;;  %s3107_s4 = sphi %s4267_s4, %s4362_s4   ;;  %s3103_s21 = sphi %s4361_s21, %s2192_s21   ;;  %s3099_s16 = sphi %s4360_s16, %s2193_s16  }
 0x297   : >> { %2180 = vst [vmem:[%s3099_s16] sm:$0xff] %v2179_v46  ;;  %v2185_v57 = vld [vmem:[%s3103_s21 + $0x18] sm:$0xff]  ;;  %p2188_p8 = scmp.ge.s32.totalorder %s2187_s19, %s4258_s29  ;;  %p2172_p9 = scmp.ge.s32.totalorder %s2173_s15, %s4258_s29 }
 0x298   : >> { %2182 = vst [vmem:[%s3099_s16 + $0x8] sm:$0xff] %v2181_v36 }
 0x299   : >> { %2184 = vst [vmem:[%s3099_s16 + $0x10] sm:$0xff] %v2183_v10  ;;  %s4375_s19 = smov (%p2188_p8, %s2187_s19), 0  ;;  %2175 = sbr.rel (!%p2172_p9) target bundleno = 662 (0x296), region = 282 }
 0x29a   : >> { %2186 = vst [vmem:[%s3099_s16 + $0x18] sm:$0xff] %v2185_v57  ;;  %s2578_s24 = sshll.u32 %s4375_s19, 5  ;;  %s4362_s4 = smov %s4375_s19 }
 0x29b   : >> { %s2192_s21 = scalar_lea.vmem %s4167_s17, %s2578_s24 [#allocation10]   ;;  %s2193_s16 = scalar_lea.vmem %s4252_s5, %s2578_s24  }
 0x29e PF: > { %s4283_s28 = sand.u32 3, %s4373_s26   ;;  %s2592_s23 = sshll.u32 %s4258_s29, 5 }
 0x29f   : > { %s2198_s14 = scalar_lea.vmem %s4167_s17, %s2592_s23 [#allocation10]   ;;  %s2200_s22 = scalar_lea.vmem %s4252_s5, %s2592_s23  }
 0x2a0   : > { %p2583_p10 = scmp.le.s32.totalorder %s4283_s28, 0 }
 0x2a1   : > { %s3113_s30 = smov (!%p2583_p10), %s2200_s22   ;;  %s3117_s18 = smov (!%p2583_p10), %s2198_s14  }
 0x2a2   : > { %2381 = sbr.rel (%p2583_p10) target bundleno = 687 (0x2af), region = 287  ;;  %s3121_s20 = smov (!%p2583_p10), 0  }
 0x2a3   : > { %s3125_s13 = smov (!%p2583_p10), 0  }
 0x2a7 LB: >> { %v2210_v30 = vld [vmem:[%s3119_s18] sm:$0xff]  ;;  %s2212_s26 = sadd.s32 1, %s3123_s20  ;;  %s2204_s13 = sadd.s32 1, %s3127_s13   ;;  %s3127_s13 = sphi %s3125_s13, %s2204_s13   ;;  %s3123_s20 = sphi %s3121_s20, %s3122_s20   ;;  %s3119_s18 = sphi %s3117_s18, %s2217_s18   ;;  %s3115_s30 = sphi %s3113_s30, %s2218_s30  }
 0x2a8   : >> { %2211 = vst [vmem:[%s3115_s30] sm:$0xff] %v2210_v30  ;;  %p2213_p11 = scmp.ge.s32.totalorder %s2212_s26, %s4283_s28  ;;  %p2203_p12 = scmp.ge.s32.totalorder %s2204_s13, %s4283_s28 }
 0x2aa   : >> { %s4377_s26 = smov (%p2213_p11, %s2212_s26), 0  ;;  %2206 = sbr.rel (!%p2203_p12) target bundleno = 679 (0x2a7), region = 293 }
 0x2ab   : >> { %s2584_s17 = sshll.u32 %s4377_s26, 3  ;;  %s3122_s20 = smov %s4377_s26  }
 0x2ac   : >> { %s2217_s18 = scalar_lea.vmem %s2198_s14, %s2584_s17 [#allocation10]   ;;  %s2218_s30 = scalar_lea.vmem %s2200_s22, %s2584_s17  }
 0x2af PF: > { %s4363_s15 = sld [smem:[#allocation15_spill]] }
 0x2b0   : > { %s4364_s29 = sld [smem:[#allocation14_spill]] }
 0x2b1   : > { %s4365_s30 = sld [smem:[#allocation16_spill]] }
 0x2b5   : > { %p25_p13 = scmp.ge.s32.totalorder %s4363_s15, 4  }
 0x2b7   :  { %27 = sbr.rel (!%p25_p13) target bundleno = 9 (0x9), region = 304 }
 0x2bc   :  { %2241 = vsyncpa [#allocation3], 1 }
 0x2bd   :  { %2243 = vsyncpa [#allocation3 + $0x1], 1 }
 0x2be   :  { %2244 = vsyncpa [#allocation5], 1 }
 0x2bf   :  { %2245 = vsyncpa [#allocation8], 1 }

</bundles_post_ra>
